<compile_context>
chip_gen: v7x
topology: tpu7x:2x2x1
jax: 0.10.0
libtpu: 0.0.40
codegen_flags: <defaults>
</compile_context>

<pallas_src>
import numpy as np

import jax
import jax.numpy as jnp
from jax.experimental import pallas as pl
from jax.experimental.pallas import tpu as pltpu


# ---------------------------------------------------------------------------
# Tiling helpers (done once at "model init"; the graph is static).
# ---------------------------------------------------------------------------
def _pick_tile(n, target=512):
    """Largest multiple of 128 that divides n and is <= target."""
    assert n % 128 == 0, "num_users + num_items must be a multiple of 128"
    t = min(target, n)
    t -= t % 128
    while n % t:
        t -= 128
    return t


def build_block_meta(graph_np, tm, tk):
    """Block-sparse metadata: per row tile, the column tiles with any nonzero.

    counts: (n_row_tiles,) int32   number of nonzero column tiles
    idx:    (n_row_tiles, max_cnt) int32  their indices; padding repeats the
            last valid index so padded grid steps re-use the already-DMA'd tile.
    """
    n = graph_np.shape[0]
    n_i, n_k = n // tm, n // tk
    blocks = graph_np.reshape(n_i, tm, n_k, tk)
    nz = np.any(blocks != 0.0, axis=(1, 3))                   # (n_i, n_k)
    counts = nz.sum(axis=1).astype(np.int32)                  # (n_i,)
    max_k = max(1, int(counts.max()))
    idx = np.zeros((n_i, max_k), np.int32)
    for i in range(n_i):
        ks = np.nonzero(nz[i])[0].astype(np.int32)
        if ks.size:
            idx[i, : ks.size] = ks
            idx[i, ks.size:] = ks[-1]
    return jnp.asarray(counts), jnp.asarray(idx)


# ---------------------------------------------------------------------------
# Kernel 1: one LightGCN propagation step, fused with the layer-sum update.
#   e_out   = Graph @ e            (block-sparse over zero tiles)
#   acc_out = acc_in + e_out       (running sum for the final layer mean)
# ---------------------------------------------------------------------------
def propagate_kernel(cnt_ref, idx_ref, g_ref, e_ref, acc_in_ref,
                     e_out_ref, acc_out_ref):
    i = pl.program_id(0)
    k = pl.program_id(1)

    @pl.when(k == 0)
    def _init():
        e_out_ref[...] = jnp.zeros_like(e_out_ref)

    # Skip padded reduction steps (this row tile has fewer nonzero col tiles).
    @pl.when(k < cnt_ref[i])
    def _accumulate():
        # bf16 x bf16 on the MXU, f32 accumulation directly in the resident
        # output block (no scratch accumulator needed).
        e_out_ref[...] += jnp.dot(
            g_ref[...],
            e_ref[...].astype(jnp.bfloat16),
            preferred_element_type=jnp.float32,
        )

    @pl.when(k == pl.num_programs(1) - 1)
    def _finalize():
        acc_out_ref[...] = acc_in_ref[...] + e_out_ref[...]


def propagate(graph_bf16, emb, acc, counts, idx):
    """Stand-in for torch.sparse.mm(Graph, all_emb), fused with acc += result."""
    N, D = emb.shape
    assert graph_bf16.shape == (N, N)
    TM = _pick_tile(N)
    TK = _pick_tile(N)
    n_i = N // TM
    max_k = idx.shape[1]

    return pl.pallas_call(
        propagate_kernel,
        out_shape=(
            jax.ShapeDtypeStruct((N, D), jnp.float32),   # Graph @ e
            jax.ShapeDtypeStruct((N, D), jnp.float32),   # acc + Graph @ e
        ),
        grid_spec=pltpu.PrefetchScalarGridSpec(
            num_scalar_prefetch=2,                       # counts, idx (SMEM)
            grid=(n_i, max_k),                           # reduction axis last
            in_specs=[
                # graph tile: column-tile index gathered from the SMEM table
                pl.BlockSpec((TM, TK), lambda i, k, c, t: (i, t[i, k])),
                # matching embedding reduction tile
                pl.BlockSpec((TK, D), lambda i, k, c, t: (t[i, k], 0)),
                # running layer-sum (resident across k; read only on last k)
                pl.BlockSpec((TM, D), lambda i, k, c, t: (i, 0)),
            ],
            out_specs=[
                pl.BlockSpec((TM, D), lambda i, k, c, t: (i, 0)),
                pl.BlockSpec((TM, D), lambda i, k, c, t: (i, 0)),
            ],
        ),
        compiler_params=pltpu.CompilerParams(
            dimension_semantics=("parallel", "arbitrary"),
            vmem_limit_bytes=48 * 1024 * 1024,
        ),
    )(counts, idx, graph_bf16, emb, acc)


# ---------------------------------------------------------------------------
# Kernel 2: gamma = sum(users_emb * items_emb, dim=1), lane-dense output.
# ---------------------------------------------------------------------------
def gamma_kernel(u_ref, i_ref, o_ref):
    s = jnp.sum(u_ref[...] * i_ref[...], axis=1)   # (TB,)
    o_ref[...] = s[None, :]                        # lane-dense (1, TB) store


def gamma_score(users_emb, items_emb):
    # TODO(synk): for training-sized batches fuse the embedding gather into
    # this kernel via scalar-prefetched indices; for tiny inference batches a
    # plain-JAX reduce would also be fine (pallas_call overhead > work).
    B, D = users_emb.shape
    TB = 512 if B > 512 else max(8, ((B + 7) // 8) * 8)
    Bp = ((B + TB - 1) // TB) * TB
    if Bp != B:
        pad = ((0, Bp - B), (0, 0))
        users_emb = jnp.pad(users_emb, pad)
        items_emb = jnp.pad(items_emb, pad)
    nt = Bp // TB

    out = pl.pallas_call(
        gamma_kernel,
        out_shape=jax.ShapeDtypeStruct((1, Bp), jnp.float32),
        grid=(nt,),
        in_specs=[
            pl.BlockSpec((TB, D), lambda b: (b, 0)),
            pl.BlockSpec((TB, D), lambda b: (b, 0)),
        ],
        out_specs=pl.BlockSpec((1, TB), lambda b: (0, b)),
        compiler_params=pltpu.CompilerParams(
            dimension_semantics=("arbitrary",),
        ),
    )(users_emb, items_emb)
    return out[0, :B]


# ---------------------------------------------------------------------------
# LightGCN.computer() / forward() equivalents (glue in plain JAX)
# ---------------------------------------------------------------------------
def lightgcn_computer(user_emb, item_emb, graph_bf16, counts, idx, n_layers):
    all_emb = jnp.concatenate([user_emb, item_emb], axis=0).astype(jnp.float32)
    e = all_emb
    acc = all_emb                          # layer-0 contribution
    for _ in range(n_layers):
        e, acc = propagate(graph_bf16, e, acc, counts, idx)
    light_out = acc / jnp.float32(n_layers + 1)   # mean over stacked layers
    num_users = user_emb.shape[0]
    return light_out[:num_users], light_out[num_users:]


def lightgcn_forward(user_emb, item_emb, graph_bf16, counts, idx,
                     n_layers, users, items):
    all_users, all_items = lightgcn_computer(
        user_emb, item_emb, graph_bf16, counts, idx, n_layers)
    users_emb = all_users[users]           # embedding gather (glue)
    items_emb = all_items[items]
    return gamma_score(users_emb, items_emb)


# ---------------------------------------------------------------------------
if __name__ == "__main__":
    num_users, num_items = 64, 192
    latent_dim = 128
    n_layers = 3
    N = num_users + num_items

    key = jax.random.PRNGKey(0)
    k_u, k_i, k_r = jax.random.split(key, 3)

    # nn.init.normal_(..., std=0.1) on both embedding tables
    user_emb = 0.1 * jax.random.normal(k_u, (num_users, latent_dim), jnp.float32)
    item_emb = 0.1 * jax.random.normal(k_i, (num_items, latent_dim), jnp.float32)

    # Synthetic symmetric-normalized bipartite graph (dataset.getSparseGraph()).
    R = (jax.random.uniform(k_r, (num_users, num_items)) < 0.05).astype(jnp.float32)
    A = jnp.zeros((N, N), jnp.float32)
    A = A.at[:num_users, num_users:].set(R)
    A = A.at[num_users:, :num_users].set(R.T)
    deg = A.sum(axis=1)
    dinv_sqrt = jnp.where(deg > 0, 1.0 / jnp.sqrt(deg), 0.0)
    graph = dinv_sqrt[:, None] * A * dinv_sqrt[None, :]

    # One-time "model init" work: bf16 graph operand + block-sparse metadata.
    graph_bf16 = graph.astype(jnp.bfloat16)
    TM = _pick_tile(N)
    TK = _pick_tile(N)
    counts, idx = build_block_meta(np.asarray(jax.device_get(graph)), TM, TK)

    users = jnp.array([0, 5, 10, 17, 23, 31, 40, 63], dtype=jnp.int32)
    items = jnp.array([1, 7, 33, 50, 99, 120, 150, 191], dtype=jnp.int32)

    fwd = jax.jit(
        lambda ue, ie, g, c, t, u, i: lightgcn_forward(ue, ie, g, c, t,
                                                       n_layers, u, i)
    )
    gamma = fwd(user_emb, item_emb, graph_bf16, counts, idx, users, items)
    gamma = jax.block_until_ready(gamma)

    # Reference 1: same bf16-quantized graph / bf16 MXU inputs, f32 accumulation
    # (bit-compatible with what the kernel computes) -> tight tolerance.
    all_emb = jnp.concatenate([user_emb, item_emb], axis=0)
    e = all_emb
    acc = all_emb
    for _ in range(n_layers):
        e = jnp.dot(graph_bf16, e.astype(jnp.bfloat16),
                    preferred_element_type=jnp.float32)
        acc = acc + e
    light_out = acc / jnp.float32(n_layers + 1)
    ref = jnp.sum(
        light_out[:num_users][users] * light_out[num_users:][items], axis=1)

    # Reference 2: original full-f32 PyTorch semantics -> loose fidelity check
    # for the bf16-graph approximation.
    e32 = all_emb
    acc32 = all_emb
    for _ in range(n_layers):
        e32 = jnp.dot(graph, e32, preferred_element_type=jnp.float32,
                      precision=jax.lax.Precision.HIGHEST)
        acc32 = acc32 + e32
    lo32 = acc32 / jnp.float32(n_layers + 1)
    ref32 = jnp.sum(lo32[:num_users][users] * lo32[num_users:][items], axis=1)

    assert gamma.shape == (users.shape[0],)
    assert jnp.allclose(gamma, ref, atol=1e-4, rtol=1e-3), (gamma, ref)
    assert jnp.allclose(gamma, ref32, atol=1e-2, rtol=5e-2), (gamma, ref32)
    print("KERNEL_OK")
</pallas_src>

<mosaic_0001>
module attributes {stable_mosaic.version = 11 : i64} {
  func.func @propagate_kernel(%arg0: i32, %arg1: i32, %arg2: memref<1xi32, #tpu.memory_space<smem>>, %arg3: memref<1x1xi32, #tpu.memory_space<smem>>, %arg4: memref<256x256xbf16, #tpu.memory_space<vmem>>, %arg5: memref<256x128xf32, #tpu.memory_space<vmem>>, %arg6: memref<256x128xf32, #tpu.memory_space<vmem>>, %arg7: memref<256x128xf32, #tpu.memory_space<vmem>>, %arg8: memref<256x128xf32, #tpu.memory_space<vmem>>) attributes {dimension_semantics = [#tpu.dimension_semantics<parallel>, #tpu.dimension_semantics<arbitrary>], iteration_bounds = array<i64: 1, 1>, scalar_prefetch = 2 : i64, scratch_operands = 0 : i64, tpu.core_type = #tpu.core_type<tc>, window_params = [{transform_indices = @transform_0, window_bounds = array<i64: 256, 256>}, {transform_indices = @transform_1, window_bounds = array<i64: 256, 128>}, {transform_indices = @transform_2, window_bounds = array<i64: 256, 128>}, {transform_indices = @transform_3, window_bounds = array<i64: 256, 128>}, {transform_indices = @transform_4, window_bounds = array<i64: 256, 128>}]} {
    %c0_i32 = arith.constant 0 : i32
    %0 = arith.cmpi eq, %arg1, %c0_i32 : i32
    %1 = arith.extui %0 : i1 to i32
    %c0_i32_0 = arith.constant 0 : i32
    %2 = arith.cmpi ne, %1, %c0_i32_0 : i32
    scf.if %2 {
      %cst = arith.constant 0.000000e+00 : f32
      %11 = vector.broadcast %cst : f32 to vector<256x128xf32>
      %c0 = arith.constant 0 : index
      %c0_4 = arith.constant 0 : index
      %12 = vector.load %arg7[%c0, %c0_4] : memref<256x128xf32, #tpu.memory_space<vmem>>, vector<256x128xf32>
      tpu.vector_store %arg7[%c0, %c0_4], %11 {strides = array<i32>} : memref<256x128xf32, #tpu.memory_space<vmem>>, vector<256x128xf32>,
    } else {
    }
    %3 = arith.index_cast %arg0 : i32 to index
    %4 = memref.load %arg2[%3] : memref<1xi32, #tpu.memory_space<smem>>
    %5 = arith.cmpi slt, %arg1, %4 : i32
    %6 = arith.extui %5 : i1 to i32
    %c0_i32_1 = arith.constant 0 : i32
    %7 = arith.cmpi ne, %6, %c0_i32_1 : i32
    scf.if %7 {
      %c0 = arith.constant 0 : index
      %c0_4 = arith.constant 0 : index
      %11 = vector.load %arg7[%c0, %c0_4] : memref<256x128xf32, #tpu.memory_space<vmem>>, vector<256x128xf32>
      %c0_5 = arith.constant 0 : index
      %c0_6 = arith.constant 0 : index
      %12 = vector.load %arg4[%c0_5, %c0_6] : memref<256x256xbf16, #tpu.memory_space<vmem>>, vector<256x256xbf16>
      %c0_7 = arith.constant 0 : index
      %c0_8 = arith.constant 0 : index
      %13 = vector.load %arg5[%c0_7, %c0_8] : memref<256x128xf32, #tpu.memory_space<vmem>>, vector<256x128xf32>
      %14 = arith.truncf %13 : vector<256x128xf32> to vector<256x128xbf16>
      %cst = arith.constant dense<0.000000e+00> : vector<256x128xf32>
      %15 = tpu.matmul %12, %14, %cst {dimension_numbers = #tpu.dot_dimension_numbers<[1], [0], [0], [1], [0, 0, 1, 1], [], []>} : vector<256x256xbf16>, vector<256x128xbf16>, vector<256x128xf32> -> vector<256x128xf32>
      %16 = arith.addf %11, %15 : vector<256x128xf32>
      %c0_9 = arith.constant 0 : index
      %c0_10 = arith.constant 0 : index
      %17 = vector.load %arg7[%c0_9, %c0_10] : memref<256x128xf32, #tpu.memory_space<vmem>>, vector<256x128xf32>
      tpu.vector_store %arg7[%c0_9, %c0_10], %16 {strides = array<i32>} : memref<256x128xf32, #tpu.memory_space<vmem>>, vector<256x128xf32>,
    } else {
    }
    %c0_i32_2 = arith.constant 0 : i32
    %8 = arith.cmpi eq, %arg1, %c0_i32_2 : i32
    %9 = arith.extui %8 : i1 to i32
    %c0_i32_3 = arith.constant 0 : i32
    %10 = arith.cmpi ne, %9, %c0_i32_3 : i32
    scf.if %10 {
      %c0 = arith.constant 0 : index
      %c0_4 = arith.constant 0 : index
      %11 = vector.load %arg6[%c0, %c0_4] : memref<256x128xf32, #tpu.memory_space<vmem>>, vector<256x128xf32>
      %c0_5 = arith.constant 0 : index
      %c0_6 = arith.constant 0 : index
      %12 = vector.load %arg7[%c0_5, %c0_6] : memref<256x128xf32, #tpu.memory_space<vmem>>, vector<256x128xf32>
      %13 = arith.addf %11, %12 : vector<256x128xf32>
      %c0_7 = arith.constant 0 : index
      %c0_8 = arith.constant 0 : index
      %14 = vector.load %arg8[%c0_7, %c0_8] : memref<256x128xf32, #tpu.memory_space<vmem>>, vector<256x128xf32>
      tpu.vector_store %arg8[%c0_7, %c0_8], %13 {strides = array<i32>} : memref<256x128xf32, #tpu.memory_space<vmem>>, vector<256x128xf32>,
    } else {
    }
    return
  }
  func.func @transform_0(%arg0: i32, %arg1: i32, %arg2: memref<1xi32, #tpu.memory_space<smem>>, %arg3: memref<1x1xi32, #tpu.memory_space<smem>>) -> (i32, i32) {
    %0 = arith.index_cast %arg0 : i32 to index
    %1 = arith.index_cast %arg1 : i32 to index
    %2 = memref.load %arg3[%0, %1] : memref<1x1xi32, #tpu.memory_space<smem>>
    %c0_i32 = arith.constant 0 : i32
    return %arg0, %2 : i32, i32
  }
  func.func @transform_1(%arg0: i32, %arg1: i32, %arg2: memref<1xi32, #tpu.memory_space<smem>>, %arg3: memref<1x1xi32, #tpu.memory_space<smem>>) -> (i32, i32) {
    %0 = arith.index_cast %arg0 : i32 to index
    %1 = arith.index_cast %arg1 : i32 to index
    %2 = memref.load %arg3[%0, %1] : memref<1x1xi32, #tpu.memory_space<smem>>
    %c0_i32 = arith.constant 0 : i32
    %c0_i32_0 = arith.constant 0 : i32
    return %2, %c0_i32 : i32, i32
  }
  func.func @transform_2(%arg0: i32, %arg1: i32, %arg2: memref<1xi32, #tpu.memory_space<smem>>, %arg3: memref<1x1xi32, #tpu.memory_space<smem>>) -> (i32, i32) {
    %c0_i32 = arith.constant 0 : i32
    %c0_i32_0 = arith.constant 0 : i32
    return %arg0, %c0_i32 : i32, i32
  }
  func.func @transform_3(%arg0: i32, %arg1: i32, %arg2: memref<1xi32, #tpu.memory_space<smem>>, %arg3: memref<1x1xi32, #tpu.memory_space<smem>>) -> (i32, i32) {
    %c0_i32 = arith.constant 0 : i32
    %c0_i32_0 = arith.constant 0 : i32
    return %arg0, %c0_i32 : i32, i32
  }
  func.func @transform_4(%arg0: i32, %arg1: i32, %arg2: memref<1xi32, #tpu.memory_space<smem>>, %arg3: memref<1x1xi32, #tpu.memory_space<smem>>) -> (i32, i32) {
    %c0_i32 = arith.constant 0 : i32
    %c0_i32_0 = arith.constant 0 : i32
    return %arg0, %c0_i32 : i32, i32
  }
}

module attributes {stable_mosaic.version = 11 : i64} {
  func.func @propagate_kernel(%arg0: i32, %arg1: i32, %arg2: memref<1xi32, #tpu.memory_space<smem>>, %arg3: memref<1x1xi32, #tpu.memory_space<smem>>, %arg4: memref<256x256xbf16, #tpu.memory_space<vmem>>, %arg5: memref<256x128xf32, #tpu.memory_space<vmem>>, %arg6: memref<256x128xf32, #tpu.memory_space<vmem>>, %arg7: memref<256x128xf32, #tpu.memory_space<vmem>>, %arg8: memref<256x128xf32, #tpu.memory_space<vmem>>) attributes {dimension_semantics = [#tpu.dimension_semantics<parallel>, #tpu.dimension_semantics<arbitrary>], iteration_bounds = array<i64: 1, 1>, scalar_prefetch = 2 : i64, scratch_operands = 0 : i64, tpu.core_type = #tpu.core_type<tc>, window_params = [{transform_indices = @transform_0, window_bounds = array<i64: 256, 256>}, {transform_indices = @transform_1, window_bounds = array<i64: 256, 128>}, {transform_indices = @transform_2, window_bounds = array<i64: 256, 128>}, {transform_indices = @transform_3, window_bounds = array<i64: 256, 128>}, {transform_indices = @transform_4, window_bounds = array<i64: 256, 128>}]} {
    %c0_i32 = arith.constant 0 : i32
    %0 = arith.cmpi eq, %arg1, %c0_i32 : i32
    %1 = arith.extui %0 : i1 to i32
    %c0_i32_0 = arith.constant 0 : i32
    %2 = arith.cmpi ne, %1, %c0_i32_0 : i32
    scf.if %2 {
      %cst = arith.constant 0.000000e+00 : f32
      %11 = vector.broadcast %cst : f32 to vector<256x128xf32>
      %c0 = arith.constant 0 : index
      %c0_4 = arith.constant 0 : index
      %12 = vector.load %arg7[%c0, %c0_4] : memref<256x128xf32, #tpu.memory_space<vmem>>, vector<256x128xf32>
      tpu.vector_store %arg7[%c0, %c0_4], %11 {strides = array<i32>} : memref<256x128xf32, #tpu.memory_space<vmem>>, vector<256x128xf32>,
    } else {
    }
    %3 = arith.index_cast %arg0 : i32 to index
    %4 = memref.load %arg2[%3] : memref<1xi32, #tpu.memory_space<smem>>
    %5 = arith.cmpi slt, %arg1, %4 : i32
    %6 = arith.extui %5 : i1 to i32
    %c0_i32_1 = arith.constant 0 : i32
    %7 = arith.cmpi ne, %6, %c0_i32_1 : i32
    scf.if %7 {
      %c0 = arith.constant 0 : index
      %c0_4 = arith.constant 0 : index
      %11 = vector.load %arg7[%c0, %c0_4] : memref<256x128xf32, #tpu.memory_space<vmem>>, vector<256x128xf32>
      %c0_5 = arith.constant 0 : index
      %c0_6 = arith.constant 0 : index
      %12 = vector.load %arg4[%c0_5, %c0_6] : memref<256x256xbf16, #tpu.memory_space<vmem>>, vector<256x256xbf16>
      %c0_7 = arith.constant 0 : index
      %c0_8 = arith.constant 0 : index
      %13 = vector.load %arg5[%c0_7, %c0_8] : memref<256x128xf32, #tpu.memory_space<vmem>>, vector<256x128xf32>
      %14 = arith.truncf %13 : vector<256x128xf32> to vector<256x128xbf16>
      %cst = arith.constant dense<0.000000e+00> : vector<256x128xf32>
      %15 = tpu.matmul %12, %14, %cst {dimension_numbers = #tpu.dot_dimension_numbers<[1], [0], [0], [1], [0, 0, 1, 1], [], []>} : vector<256x256xbf16>, vector<256x128xbf16>, vector<256x128xf32> -> vector<256x128xf32>
      %16 = arith.addf %11, %15 : vector<256x128xf32>
      %c0_9 = arith.constant 0 : index
      %c0_10 = arith.constant 0 : index
      %17 = vector.load %arg7[%c0_9, %c0_10] : memref<256x128xf32, #tpu.memory_space<vmem>>, vector<256x128xf32>
      tpu.vector_store %arg7[%c0_9, %c0_10], %16 {strides = array<i32>} : memref<256x128xf32, #tpu.memory_space<vmem>>, vector<256x128xf32>,
    } else {
    }
    %c0_i32_2 = arith.constant 0 : i32
    %8 = arith.cmpi eq, %arg1, %c0_i32_2 : i32
    %9 = arith.extui %8 : i1 to i32
    %c0_i32_3 = arith.constant 0 : i32
    %10 = arith.cmpi ne, %9, %c0_i32_3 : i32
    scf.if %10 {
      %c0 = arith.constant 0 : index
      %c0_4 = arith.constant 0 : index
      %11 = vector.load %arg6[%c0, %c0_4] : memref<256x128xf32, #tpu.memory_space<vmem>>, vector<256x128xf32>
      %c0_5 = arith.constant 0 : index
      %c0_6 = arith.constant 0 : index
      %12 = vector.load %arg7[%c0_5, %c0_6] : memref<256x128xf32, #tpu.memory_space<vmem>>, vector<256x128xf32>
      %13 = arith.addf %11, %12 : vector<256x128xf32>
      %c0_7 = arith.constant 0 : index
      %c0_8 = arith.constant 0 : index
      %14 = vector.load %arg8[%c0_7, %c0_8] : memref<256x128xf32, #tpu.memory_space<vmem>>, vector<256x128xf32>
      tpu.vector_store %arg8[%c0_7, %c0_8], %13 {strides = array<i32>} : memref<256x128xf32, #tpu.memory_space<vmem>>, vector<256x128xf32>,
    } else {
    }
    return
  }
  func.func @transform_0(%arg0: i32, %arg1: i32, %arg2: memref<1xi32, #tpu.memory_space<smem>>, %arg3: memref<1x1xi32, #tpu.memory_space<smem>>) -> (i32, i32) {
    %0 = arith.index_cast %arg0 : i32 to index
    %1 = arith.index_cast %arg1 : i32 to index
    %2 = memref.load %arg3[%0, %1] : memref<1x1xi32, #tpu.memory_space<smem>>
    %c0_i32 = arith.constant 0 : i32
    return %arg0, %2 : i32, i32
  }
  func.func @transform_1(%arg0: i32, %arg1: i32, %arg2: memref<1xi32, #tpu.memory_space<smem>>, %arg3: memref<1x1xi32, #tpu.memory_space<smem>>) -> (i32, i32) {
    %0 = arith.index_cast %arg0 : i32 to index
    %1 = arith.index_cast %arg1 : i32 to index
    %2 = memref.load %arg3[%0, %1] : memref<1x1xi32, #tpu.memory_space<smem>>
    %c0_i32 = arith.constant 0 : i32
    %c0_i32_0 = arith.constant 0 : i32
    return %2, %c0_i32 : i32, i32
  }
  func.func @transform_2(%arg0: i32, %arg1: i32, %arg2: memref<1xi32, #tpu.memory_space<smem>>, %arg3: memref<1x1xi32, #tpu.memory_space<smem>>) -> (i32, i32) {
    %c0_i32 = arith.constant 0 : i32
    %c0_i32_0 = arith.constant 0 : i32
    return %arg0, %c0_i32 : i32, i32
  }
  func.func @transform_3(%arg0: i32, %arg1: i32, %arg2: memref<1xi32, #tpu.memory_space<smem>>, %arg3: memref<1x1xi32, #tpu.memory_space<smem>>) -> (i32, i32) {
    %c0_i32 = arith.constant 0 : i32
    %c0_i32_0 = arith.constant 0 : i32
    return %arg0, %c0_i32 : i32, i32
  }
  func.func @transform_4(%arg0: i32, %arg1: i32, %arg2: memref<1xi32, #tpu.memory_space<smem>>, %arg3: memref<1x1xi32, #tpu.memory_space<smem>>) -> (i32, i32) {
    %c0_i32 = arith.constant 0 : i32
    %c0_i32_0 = arith.constant 0 : i32
    return %arg0, %c0_i32 : i32, i32
  }
}

module attributes {stable_mosaic.version = 11 : i64} {
  func.func @gamma_kernel(%arg0: i32, %arg1: memref<8x128xf32, #tpu.memory_space<vmem>>, %arg2: memref<8x128xf32, #tpu.memory_space<vmem>>, %arg3: memref<1x8xf32, #tpu.memory_space<vmem>>) attributes {dimension_semantics = [#tpu.dimension_semantics<arbitrary>], iteration_bounds = array<i64: 1>, scalar_prefetch = 0 : i64, scratch_operands = 0 : i64, tpu.core_type = #tpu.core_type<tc>, window_params = [{transform_indices = @transform_0, window_bounds = array<i64: 8, 128>}, {transform_indices = @transform_1, window_bounds = array<i64: 8, 128>}, {transform_indices = @transform_2, window_bounds = array<i64: 1, 8>}]} {
    %c0 = arith.constant 0 : index
    %c0_0 = arith.constant 0 : index
    %0 = vector.load %arg1[%c0, %c0_0] : memref<8x128xf32, #tpu.memory_space<vmem>>, vector<8x128xf32>
    %c0_1 = arith.constant 0 : index
    %c0_2 = arith.constant 0 : index
    %1 = vector.load %arg2[%c0_1, %c0_2] : memref<8x128xf32, #tpu.memory_space<vmem>>, vector<8x128xf32>
    %2 = arith.mulf %0, %1 : vector<8x128xf32>
    %cst = arith.constant dense<0.000000e+00> : vector<8xf32>
    %3 = vector.multi_reduction <add>, %2, %cst [1] : vector<8x128xf32> to vector<8xf32>
    %4 = vector.shape_cast %3 : vector<8xf32> to vector<1x8xf32>
    %c0_3 = arith.constant 0 : index
    %c0_4 = arith.constant 0 : index
    %5 = vector.load %arg3[%c0_3, %c0_4] : memref<1x8xf32, #tpu.memory_space<vmem>>, vector<1x8xf32>
    tpu.vector_store %arg3[%c0_3, %c0_4], %4 {strides = array<i32>} : memref<1x8xf32, #tpu.memory_space<vmem>>, vector<1x8xf32>,
    return
  }
  func.func @transform_0(%arg0: i32) -> (i32, i32) {
    %c0_i32 = arith.constant 0 : i32
    %c0_i32_0 = arith.constant 0 : i32
    return %arg0, %c0_i32 : i32, i32
  }
  func.func @transform_1(%arg0: i32) -> (i32, i32) {
    %c0_i32 = arith.constant 0 : i32
    %c0_i32_0 = arith.constant 0 : i32
    return %arg0, %c0_i32 : i32, i32
  }
  func.func @transform_2(%arg0: i32) -> (i32, i32) {
    %c0_i32 = arith.constant 0 : i32
    %c0_i32_0 = arith.constant 0 : i32
    return %c0_i32, %arg0 : i32, i32
  }
}

</mosaic_0001>

<bundles_post_ra>
// kernel: _lambda_.7
= control target key start
LH: loop header
LB: loop body
LE: loop exit
PB: predicated region body
PF: predicated region fallthrough
CT: control target
= control target key end

     0   :  { %s100_s0 = inlined_call_operand.vmem [shape: f32[8,128], index: 0, kind: input, shape index: {}]   ;;  %s101_s1 = inlined_call_operand.vmem [shape: f32[8,128], index: 1, kind: input, shape index: {}]   ;;  %s102_s2 = inlined_call_operand.hbm [shape: f32[1,8], index: 2, kind: output, shape index: {}]  }
   0x1   :  { %v12_v0 = vld [vmem:[%s100_s0] sm:$0xff] }
   0x2   :  { %v13_v1 = vld [vmem:[%s101_s1] sm:$0xff] }
   0x3   :  { %7 = vsyncpa [#allocation3], 0  ;;  %v14_v2 = vmul.f32 %v13_v1, %v12_v0  ;;  %v18_v3 = vlaneseq  ;;  %s66_s13 = smov [#allocation2]   ;;  %vm25_vm0 = vcmask 57344  }
   0x4   :  { %s33_s14 = sshll.u32 %s66_s13, 4  ;;  %s34_s14 = int_to_ptr.vmem [resolvable:$true] %s33_s14 }
   0x5   :  { %15 = vadd.xlane.f32.xlu0 %v14_v2  ;;  %v19_v4 = vand.u32 127, %v18_v3  ;;  %v21_v5 = vshrl.u32 %v18_v3, 7  ;;  %s42_s15 = scalar_lea.vmem %s34_s14, 16  ;;  %s46_s0 = scalar_lea.vmem %s34_s14, 32 }
   0x6   :  { %p43_p0 = scmp.ne.s32.totalorder %s34_s14, %s42_s15  ;;  %p47_p1 = scmp.lt.s32.totalorder %s34_s14, %s34_s14 }
   0x7   :  { %v22_v6 = vsub.s32 %v19_v4, %v21_v5  ;;  %p48_p2 = scmp.lt.s32.totalorder %s46_s0, %s42_s15 }
   0x9   :  { %p49_p3 = por %p48_p2, %p47_p1 }
   0xb   :  { %p50_p4 = pnand %p49_p3, %p43_p0 }
  0x92   :  { %v16_v7 = vpop.xlane.xlu0 %15 }
  0x93   :  { %v23_v8 = vrot.slane %v16_v7, %v22_v6 }
  0x95   :  { %26 = vst.msk [vmem:[#allocation2] sm:$0x1] %vm25_vm0, %v23_v8 }
  0x96   :  { %53 = shalt.err (!%p50_p4)
}
  0x97   :  { %s54_s17 = scalar_lea.hbm %s102_s2, 16 }
  0x98   :  { %p55_p5 = scmp.ne.s32.totalorder %s102_s2, %s54_s17  ;;  %p58_p6 = scmp.lt.u32.totalorder %s54_s17, %s102_s2 }
  0x9a   :  { %p60_p7 = pnand %p58_p6, %p55_p5 }
  0x9c   :  { %63 = shalt.err (!%p60_p7)
}
  0x9d   :  { %36 = dma.vmem_to_hbm [thread:$0]  %s34_s14, 16, %s102_s2, [#allocation3]  }
  0x9e   :  { %64 = dma.done.wait [#allocation3], 16  }
  0x9f   :  { %65 = vsyncadd [#allocation3], 4294967280 }
  0xa0   :  { %40 = vsyncpa [#allocation3], 1 }

// kernel: _lambda_.4
= control target key start
LH: loop header
LB: loop body
LE: loop exit
PB: predicated region body
PF: predicated region fallthrough
CT: control target
= control target key end

     0   :  { %v999_v0 = vmov 0.0   ;;  %s1710_s0 = inlined_call_operand.<no memory space> [shape: s32[1], index: 0, kind: input, shape index: {}]   ;;  %s1711_s1 = inlined_call_operand.<no memory space> [shape: s32[1,1], index: 1, kind: input, shape index: {}]   ;;  %s1712_s4 = inlined_call_operand.vmem [shape: f32[256,128], index: 4, kind: input, shape index: {}, may-alias: {3,4}]   ;;  %s1713_s5 = inlined_call_operand.vmem [shape: f32[256,128], index: 5, kind: output, shape index: {0}]   ;;  %s1714_s6 = inlined_call_operand.vmem [shape: f32[256,128], index: 6, kind: output, shape index: {1}]   ;;  %s1715_s2 = inlined_call_operand.vmem [shape: bf16[256,256], index: 2, kind: input, shape index: {}]   ;;  %s1716_s3 = inlined_call_operand.vmem [shape: f32[256,128], index: 3, kind: input, shape index: {}, may-alias: {3,4}]  }
   0x1   :  { %s784_s23 = sshll.u32 %s1711_s1, 1  ;;  %s786_s26 = sshll.u32 %s1711_s1, 5  ;;  %99 = vst [vmem:[%s1713_s5] sm:$0xff] %v999_v0  ;;  %100 = vst [vmem:[%s1713_s5 + $0x8] sm:$0xff] %v999_v0 }
   0x2   :  { %101 = vst [vmem:[%s1713_s5 + $0x10] sm:$0xff] %v999_v0  ;;  %102 = vst [vmem:[%s1713_s5 + $0x18] sm:$0xff] %v999_v0  ;;  %p71_p0 = scmp.lt.s32.totalorder %s784_s23, 1  ;;  %p85_p1 = scmp.lt.s32.totalorder %s786_s26, 31 }
   0x3   :  { %103 = vst [vmem:[%s1713_s5 + $0x20] sm:$0xff] %v999_v0  ;;  %104 = vst [vmem:[%s1713_s5 + $0x28] sm:$0xff] %v999_v0  ;;  %p789_p2 = scmp.le.s32.totalorder %s1710_s0, 0 }
   0x4   :  { %105 = vst [vmem:[%s1713_s5 + $0x30] sm:$0xff] %v999_v0  ;;  %106 = vst [vmem:[%s1713_s5 + $0x38] sm:$0xff] %v999_v0  ;;  %s1718_s23 = smov (!%p71_p0, %s784_s23), 1  ;;  %s1720_s26 = smov (!%p85_p1, %s786_s26), 31 }
   0x5   :  { %107 = vst [vmem:[%s1713_s5 + $0x40] sm:$0xff] %v999_v0  ;;  %108 = vst [vmem:[%s1713_s5 + $0x48] sm:$0xff] %v999_v0  ;;  %s785_s9 = sshll.u32 %s1718_s23, 2  ;;  %s787_s13 = sshll.u32 %s1720_s26, 3 }
   0x6   :  { %109 = vst [vmem:[%s1713_s5 + $0x50] sm:$0xff] %v999_v0  ;;  %110 = vst [vmem:[%s1713_s5 + $0x58] sm:$0xff] %v999_v0  ;;  %s1156_s12 = scalar_lea.vmem %s1715_s2, %s785_s9  ;;  %s1161_s16 = scalar_lea.vmem %s1716_s3, %s787_s13 }
   0x7   :  { %111 = vst [vmem:[%s1713_s5 + $0x60] sm:$0xff] %v999_v0  ;;  %112 = vst [vmem:[%s1713_s5 + $0x68] sm:$0xff] %v999_v0  ;;  %v216_v1 = vld [vmem:[%s1161_s16 + $0x80] sm:$0xff] (!%p789_p2)  ;;  %v217_v2 = vld [vmem:[%s1161_s16 + $0x88] sm:$0xff] (!%p789_p2) }
   0x8   :  { %113 = vst [vmem:[%s1713_s5 + $0x70] sm:$0xff] %v999_v0  ;;  %114 = vst [vmem:[%s1713_s5 + $0x78] sm:$0xff] %v999_v0  ;;  %v200_v3 = vld [vmem:[%s1161_s16] sm:$0xff] (!%p789_p2)  ;;  %v240_v4 = vpack.c.bf16 (!%p789_p2), %v217_v2, %v216_v1  ;;  %v201_v5 = vld [vmem:[%s1161_s16 + $0x8] sm:$0xff] (!%p789_p2) }
   0x9   :  { %115 = vst [vmem:[%s1713_s5 + $0x80] sm:$0xff] %v999_v0  ;;  %116 = vst [vmem:[%s1713_s5 + $0x88] sm:$0xff] %v999_v0  ;;  %v218_v6 = vld [vmem:[%s1161_s16 + $0x90] sm:$0xff] (!%p789_p2)  ;;  %v219_v7 = vld [vmem:[%s1161_s16 + $0x98] sm:$0xff] (!%p789_p2)  ;;  %v232_v8 = vpack.c.bf16 (!%p789_p2), %v201_v5, %v200_v3 }
   0xa   :  { %117 = vst [vmem:[%s1713_s5 + $0x90] sm:$0xff] %v999_v0  ;;  %118 = vst [vmem:[%s1713_s5 + $0x98] sm:$0xff] %v999_v0  ;;  %135 = sbr.rel (%p789_p2) target bundleno = 318 (0x13e), region = 21  ;;  %v241_v9 = vpack.c.bf16 (!%p789_p2), %v219_v7, %v218_v6  ;;  %v202_v10 = vld [vmem:[%s1161_s16 + $0x10] sm:$0xff] (!%p789_p2)  ;;  %v203_v11 = vld [vmem:[%s1161_s16 + $0x18] sm:$0xff] (!%p789_p2)  ;;  %822 = vmatprep.subr.bf16.mxu0 (!%p789_p2), %v240_v4  ;;  %934 = vmatprep.subr.bf16.mxu1 (!%p789_p2), %v240_v4 }
   0xb   :  { %119 = vst [vmem:[%s1713_s5 + $0xa0] sm:$0xff] %v999_v0  ;;  %120 = vst [vmem:[%s1713_s5 + $0xa8] sm:$0xff] %v999_v0  ;;  %v220_v12 = vld [vmem:[%s1161_s16 + $0xa0] sm:$0xff] (!%p789_p2)  ;;  %v221_v13 = vld [vmem:[%s1161_s16 + $0xa8] sm:$0xff] (!%p789_p2)  ;;  %823 = vmatpush3.bf16.msra.mxu0 (!%p789_p2), %v232_v8  ;;  %942 = vmatpush3.bf16.msra.mxu1 (!%p789_p2), %v232_v8  ;;  %v233_v14 = vpack.c.bf16 (!%p789_p2), %v203_v11, %v202_v10 }
   0xc   :  { %121 = vst [vmem:[%s1713_s5 + $0xb0] sm:$0xff] %v999_v0  ;;  %122 = vst [vmem:[%s1713_s5 + $0xb8] sm:$0xff] %v999_v0  ;;  %824 = vmatprep.subr.bf16.mxu0 (!%p789_p2), %v241_v9  ;;  %935 = vmatprep.subr.bf16.mxu1 (!%p789_p2), %v241_v9  ;;  %v242_v15 = vpack.c.bf16 (!%p789_p2), %v221_v13, %v220_v12  ;;  %v204_v16 = vld [vmem:[%s1161_s16 + $0x20] sm:$0xff] (!%p789_p2)  ;;  %v205_v17 = vld [vmem:[%s1161_s16 + $0x28] sm:$0xff] (!%p789_p2) }
   0xd   :  { %123 = vst [vmem:[%s1713_s5 + $0xc0] sm:$0xff] %v999_v0  ;;  %124 = vst [vmem:[%s1713_s5 + $0xc8] sm:$0xff] %v999_v0  ;;  %v222_v18 = vld [vmem:[%s1161_s16 + $0xb0] sm:$0xff] (!%p789_p2)  ;;  %v223_v19 = vld [vmem:[%s1161_s16 + $0xb8] sm:$0xff] (!%p789_p2)  ;;  %v234_v20 = vpack.c.bf16 (!%p789_p2), %v205_v17, %v204_v16 }
   0xe   :  { %125 = vst [vmem:[%s1713_s5 + $0xd0] sm:$0xff] %v999_v0  ;;  %126 = vst [vmem:[%s1713_s5 + $0xd8] sm:$0xff] %v999_v0  ;;  %v243_v21 = vpack.c.bf16 (!%p789_p2), %v223_v19, %v222_v18  ;;  %v206_v22 = vld [vmem:[%s1161_s16 + $0x30] sm:$0xff] (!%p789_p2)  ;;  %v207_v23 = vld [vmem:[%s1161_s16 + $0x38] sm:$0xff] (!%p789_p2) }
   0xf   :  { %127 = vst [vmem:[%s1713_s5 + $0xe0] sm:$0xff] %v999_v0  ;;  %128 = vst [vmem:[%s1713_s5 + $0xe8] sm:$0xff] %v999_v0  ;;  %825 = vmatpush3.bf16.msra.mxu0 (!%p789_p2), %v233_v14  ;;  %943 = vmatpush3.bf16.msra.mxu1 (!%p789_p2), %v233_v14  ;;  %v224_v24 = vld [vmem:[%s1161_s16 + $0xc0] sm:$0xff] (!%p789_p2)  ;;  %v225_v25 = vld [vmem:[%s1161_s16 + $0xc8] sm:$0xff] (!%p789_p2)  ;;  %v235_v29 = vpack.c.bf16 (!%p789_p2), %v207_v23, %v206_v22 }
  0x10   :  { %129 = vst [vmem:[%s1713_s5 + $0xf0] sm:$0xff] %v999_v0  ;;  %130 = vst [vmem:[%s1713_s5 + $0xf8] sm:$0xff] %v999_v0  ;;  %826 = vmatprep.subr.bf16.mxu0 (!%p789_p2), %v242_v15  ;;  %936 = vmatprep.subr.bf16.mxu1 (!%p789_p2), %v242_v15  ;;  %v208_v26 = vld [vmem:[%s1161_s16 + $0x40] sm:$0xff] (!%p789_p2)  ;;  %v209_v27 = vld [vmem:[%s1161_s16 + $0x48] sm:$0xff] (!%p789_p2)  ;;  %v244_v31 = vpack.c.bf16 (!%p789_p2), %v225_v25, %v224_v24 }
  0x11   :  { %v953_v28 = vld [vmem:[%s1156_s12 + $0x4] ss:$8 sps:$4 sm:$0xff]   ;;  %v226_v30 = vld [vmem:[%s1161_s16 + $0xd0] sm:$0xff]  ;;  %v227_v33 = vld [vmem:[%s1161_s16 + $0xd8] sm:$0xff]  ;;  %v236_v34 = vpack.c.bf16 %v209_v27, %v208_v26 }
  0x12   :  { %v956_v32 = vld [vmem:[%s1156_s12 + $0x84] ss:$8 sps:$4 sm:$0xff]   ;;  %440 = vmatprep.mubr.bf16.mxu0 %v953_v28  ;;  %v210_v35 = vld [vmem:[%s1161_s16 + $0x50] sm:$0xff]  ;;  %v245_v36 = vpack.c.bf16 %v227_v33, %v226_v30  ;;  %v211_v37 = vld [vmem:[%s1161_s16 + $0x58] sm:$0xff] }
  0x13   :  { %827 = vmatpush3.bf16.msra.mxu0 %v234_v20  ;;  %944 = vmatpush3.bf16.msra.mxu1 %v234_v20  ;;  %v228_v38 = vld [vmem:[%s1161_s16 + $0xe0] sm:$0xff]  ;;  %v229_v39 = vld [vmem:[%s1161_s16 + $0xe8] sm:$0xff]  ;;  %v237_v40 = vpack.c.bf16 %v211_v37, %v210_v35  ;;  %v230_v44 = vld [vmem:[%s1161_s16 + $0xf0] sm:$0xff] }
  0x14   :  { %828 = vmatprep.subr.bf16.mxu0 %v243_v21  ;;  %937 = vmatprep.subr.bf16.mxu1 %v243_v21  ;;  %v212_v41 = vld [vmem:[%s1161_s16 + $0x60] sm:$0xff]  ;;  %v213_v42 = vld [vmem:[%s1161_s16 + $0x68] sm:$0xff]  ;;  %v246_v43 = vpack.c.bf16 %v229_v39, %v228_v38  ;;  %v231_v45 = vld [vmem:[%s1161_s16 + $0xf8] sm:$0xff] }
  0x15   :  { %504 = vmatprep.mubr.bf16.mxu1 %v956_v32  ;;  %v238_v46 = vpack.c.bf16 %v213_v42, %v212_v41  ;;  %v214_v47 = vld [vmem:[%s1161_s16 + $0x70] sm:$0xff]  ;;  %v247_v48 = vpack.c.bf16 %v231_v45, %v230_v44  ;;  %v215_v49 = vld [vmem:[%s1161_s16 + $0x78] sm:$0xff]  ;;  %v951_v51 = vld [vmem:[%s1156_s12] ss:$8 sps:$4 sm:$0xff]  }
  0x16   :  { %v239_v50 = vpack.c.bf16 %v215_v49, %v214_v47  ;;  %v954_v52 = vld [vmem:[%s1156_s12 + $0x80] ss:$8 sps:$4 sm:$0xff]   ;;  %v957_v53 = vld [vmem:[%s1156_s12 + $0x14] ss:$8 sps:$4 sm:$0xff]   ;;  %v961_v55 = vld [vmem:[%s1156_s12 + $0x10] ss:$8 sps:$4 sm:$0xff]  }
  0x17   :  { %829 = vmatpush3.bf16.msra.mxu0 %v235_v29  ;;  %945 = vmatpush3.bf16.msra.mxu1 %v235_v29  ;;  %v959_v54 = vld [vmem:[%s1156_s12 + $0x94] ss:$8 sps:$4 sm:$0xff]   ;;  %v962_v56 = vld [vmem:[%s1156_s12 + $0x90] ss:$8 sps:$4 sm:$0xff]   ;;  %v963_v57 = vld [vmem:[%s1156_s12 + $0x24] ss:$8 sps:$4 sm:$0xff]  }
  0x18   :  { %830 = vmatprep.subr.bf16.mxu0 %v244_v31  ;;  %938 = vmatprep.subr.bf16.mxu1 %v244_v31  ;;  %v965_v58 = vld [vmem:[%s1156_s12 + $0xa4] ss:$8 sps:$4 sm:$0xff]   ;;  %v967_v59 = vld [vmem:[%s1156_s12 + $0x20] ss:$8 sps:$4 sm:$0xff]   ;;  %v969_v61 = vld [vmem:[%s1156_s12 + $0x34] ss:$8 sps:$4 sm:$0xff]  }
  0x19   :  { %v968_v60 = vld [vmem:[%s1156_s12 + $0xa0] ss:$8 sps:$4 sm:$0xff]   ;;  %v971_v62 = vld [vmem:[%s1156_s12 + $0xb4] ss:$8 sps:$4 sm:$0xff]   ;;  %v973_v63 = vld [vmem:[%s1156_s12 + $0x30] ss:$8 sps:$4 sm:$0xff]  }
  0x1a   :  { %v974_v0 = vld [vmem:[%s1156_s12 + $0xb0] ss:$8 sps:$4 sm:$0xff]   ;;  %v975_v1 = vld [vmem:[%s1156_s12 + $0x44] ss:$8 sps:$4 sm:$0xff]   ;;  %v979_v3 = vld [vmem:[%s1156_s12 + $0x40] ss:$8 sps:$4 sm:$0xff]  }
  0x1b   :  { %831 = vmatpush3.bf16.msra.mxu0 %v236_v34  ;;  %946 = vmatpush3.bf16.msra.mxu1 %v236_v34  ;;  %v977_v2 = vld [vmem:[%s1156_s12 + $0xc4] ss:$8 sps:$4 sm:$0xff]   ;;  %v980_v4 = vld [vmem:[%s1156_s12 + $0xc0] ss:$8 sps:$4 sm:$0xff]   ;;  %v981_v5 = vld [vmem:[%s1156_s12 + $0x54] ss:$8 sps:$4 sm:$0xff]  }
  0x1c   :  { %832 = vmatprep.subr.bf16.mxu0 %v245_v36  ;;  %939 = vmatprep.subr.bf16.mxu1 %v245_v36  ;;  %v983_v6 = vld [vmem:[%s1156_s12 + $0xd4] ss:$8 sps:$4 sm:$0xff]   ;;  %v985_v7 = vld [vmem:[%s1156_s12 + $0x50] ss:$8 sps:$4 sm:$0xff]   ;;  %v987_v9 = vld [vmem:[%s1156_s12 + $0x64] ss:$8 sps:$4 sm:$0xff]  }
  0x1d   :  { %v986_v8 = vld [vmem:[%s1156_s12 + $0xd0] ss:$8 sps:$4 sm:$0xff]   ;;  %v989_v10 = vld [vmem:[%s1156_s12 + $0xe4] ss:$8 sps:$4 sm:$0xff]   ;;  %v991_v11 = vld [vmem:[%s1156_s12 + $0x60] ss:$8 sps:$4 sm:$0xff]  }
  0x1e   :  { %v992_v12 = vld [vmem:[%s1156_s12 + $0xe0] ss:$8 sps:$4 sm:$0xff]   ;;  %v993_v13 = vld [vmem:[%s1156_s12 + $0x74] ss:$8 sps:$4 sm:$0xff]   ;;  %v997_v15 = vld [vmem:[%s1156_s12 + $0x70] ss:$8 sps:$4 sm:$0xff]  }
  0x1f   :  { %833 = vmatpush3.bf16.msra.mxu0 %v237_v40  ;;  %947 = vmatpush3.bf16.msra.mxu1 %v237_v40  ;;  %v995_v14 = vld [vmem:[%s1156_s12 + $0xf4] ss:$8 sps:$4 sm:$0xff]   ;;  %v998_v16 = vld [vmem:[%s1156_s12 + $0xf0] ss:$8 sps:$4 sm:$0xff]   ;;  %v136_v19 = vld [vmem:[%s1713_s5] sm:$0xff] }
  0x20   :  { %834 = vmatprep.subr.bf16.mxu0 %v246_v43  ;;  %940 = vmatprep.subr.bf16.mxu1 %v246_v43  ;;  %v152_v21 = vld [vmem:[%s1713_s5 + $0x80] sm:$0xff]  ;;  %v137_v27 = vld [vmem:[%s1713_s5 + $0x8] sm:$0xff]  ;;  %v138_v39 = vld [vmem:[%s1713_s5 + $0x10] sm:$0xff] }
  0x21   :  { %v153_v29 = vld [vmem:[%s1713_s5 + $0x88] sm:$0xff]  ;;  %v154_v41 = vld [vmem:[%s1713_s5 + $0x90] sm:$0xff]  ;;  %v139_v47 = vld [vmem:[%s1713_s5 + $0x18] sm:$0xff] }
  0x22   :  { %v155_v49 = vld [vmem:[%s1713_s5 + $0x98] sm:$0xff] }
  0x23   :  { %835 = vmatpush3.bf16.msra.mxu0 %v238_v46  ;;  %948 = vmatpush3.bf16.msra.mxu1 %v238_v46 }
  0x24   :  { %836 = vmatprep.subr.bf16.mxu0 %v247_v48  ;;  %941 = vmatprep.subr.bf16.mxu1 %v247_v48 }
  0x27   :  { %837 = vmatpush3.bf16.msra.mxu0 %v239_v50  ;;  %949 = vmatpush3.bf16.msra.mxu1 %v239_v50 }
  0x2a   :  { %441 = vmatmul.mubr.bf16.vlgmr.msra.gmra.mrb[0].mxu0 %v951_v51  ;;  %505 = vmatmul.mubr.bf16.vlgmr.msra.gmra.mrb[0].mxu1 %v954_v52 }
  0x2b   :  { %448 = vmatprep.mubr.bf16.mxu0 %v957_v53  ;;  %512 = vmatprep.mubr.bf16.mxu1 %v959_v54 }
  0x32   :  { %449 = vmatmul.mubr.bf16.gmra.mrb[4].mxu0 %v961_v55  ;;  %513 = vmatmul.mubr.bf16.gmra.mrb[4].mxu1 %v962_v56 }
  0x33   :  { %456 = vmatprep.mubr.bf16.mxu0 %v963_v57  ;;  %520 = vmatprep.mubr.bf16.mxu1 %v965_v58 }
  0x3a   :  { %457 = vmatmul.mubr.bf16.gmra.mrb[8].mxu0 %v967_v59  ;;  %521 = vmatmul.mubr.bf16.gmra.mrb[8].mxu1 %v968_v60  ;;  %v140_v59 = vld [vmem:[%s1713_s5 + $0x20] sm:$0xff] }
  0x3b   :  { %464 = vmatprep.mubr.bf16.mxu0 %v969_v61  ;;  %528 = vmatprep.mubr.bf16.mxu1 %v971_v62  ;;  %v156_v61 = vld [vmem:[%s1713_s5 + $0xa0] sm:$0xff] }
  0x42   :  { %465 = vmatmul.mubr.bf16.gmra.mrb[12].mxu0 %v973_v63  ;;  %529 = vmatmul.mubr.bf16.gmra.mrb[12].mxu1 %v974_v0 }
  0x43   :  { %472 = vmatprep.mubr.bf16.mxu0 %v975_v1  ;;  %536 = vmatprep.mubr.bf16.mxu1 %v977_v2 }
  0x4a   :  { %473 = vmatmul.mubr.bf16.gmra.mrb[16].mxu0 %v979_v3  ;;  %537 = vmatmul.mubr.bf16.gmra.mrb[16].mxu1 %v980_v4  ;;  %v141_v3 = vld [vmem:[%s1713_s5 + $0x28] sm:$0xff] }
  0x4b   :  { %480 = vmatprep.mubr.bf16.mxu0 %v981_v5  ;;  %544 = vmatprep.mubr.bf16.mxu1 %v983_v6  ;;  %v157_v5 = vld [vmem:[%s1713_s5 + $0xa8] sm:$0xff] }
  0x52   :  { %481 = vmatmul.mubr.bf16.gmra.mrb[20].mxu0 %v985_v7  ;;  %545 = vmatmul.mubr.bf16.gmra.mrb[20].mxu1 %v986_v8 }
  0x53   :  { %488 = vmatprep.mubr.bf16.mxu0 %v987_v9  ;;  %552 = vmatprep.mubr.bf16.mxu1 %v989_v10 }
  0x5a   :  { %489 = vmatmul.mubr.bf16.gmra.mrb[24].mxu0 %v991_v11  ;;  %553 = vmatmul.mubr.bf16.gmra.mrb[24].mxu1 %v992_v12 }
  0x5b   :  { %496 = vmatprep.mubr.bf16.mxu0 %v993_v13  ;;  %560 = vmatprep.mubr.bf16.mxu1 %v995_v14 }
  0x62   :  { %497 = vmatmul.mubr.bf16.gmra.mrb[28].mxu0 %v997_v15  ;;  %561 = vmatmul.mubr.bf16.gmra.mrb[28].mxu1 %v998_v16  ;;  %v142_v15 = vld [vmem:[%s1713_s5 + $0x30] sm:$0xff] }
  0xfd   :  { %v838_v17 = vpop.f32.mrb[0].mxu0  ;;  %v886_v18 = vpop.f32.mrb[0].mxu1 }
  0xfe   :  { %v839_v20 = vpop.f32.mrb[1].mxu0  ;;  %v887_v22 = vpop.f32.mrb[1].mxu1 }
  0xff   :  { %v840_v23 = vadd.f32 %v839_v20, %v838_v17  ;;  %v888_v24 = vadd.f32 %v887_v22, %v886_v18  ;;  %v841_v25 = vpop.f32.mrb[2].mxu0  ;;  %v889_v26 = vpop.f32.mrb[2].mxu1  ;;  %v158_v17 = vld [vmem:[%s1713_s5 + $0xb0] sm:$0xff] }
 0x100   :  { %v842_v28 = vpop.f32.mrb[3].mxu0  ;;  %v890_v30 = vpop.f32.mrb[3].mxu1 }
 0x101   :  { %v569_v31 = vadd.f32 %v840_v23, %v136_v19  ;;  %v585_v32 = vadd.f32 %v888_v24, %v152_v21  ;;  %v843_v33 = vadd.f32 %v842_v28, %v841_v25  ;;  %v891_v34 = vadd.f32 %v890_v30, %v889_v26  ;;  %v143_v23 = vld [vmem:[%s1713_s5 + $0x38] sm:$0xff] }
 0x102   :  { %v159_v25 = vld [vmem:[%s1713_s5 + $0xb8] sm:$0xff] }
 0x103   :  { %601 = vst [vmem:[%s1713_s5] sm:$0xff] %v569_v31  ;;  %617 = vst [vmem:[%s1713_s5 + $0x80] sm:$0xff] %v585_v32  ;;  %v570_v35 = vadd.f32 %v843_v33, %v137_v27  ;;  %v586_v36 = vadd.f32 %v891_v34, %v153_v29 }
 0x105   :  { %602 = vst [vmem:[%s1713_s5 + $0x8] sm:$0xff] %v570_v35  ;;  %618 = vst [vmem:[%s1713_s5 + $0x88] sm:$0xff] %v586_v36  ;;  %v844_v37 = vpop.f32.mrb[4].mxu0  ;;  %v892_v38 = vpop.f32.mrb[4].mxu1  ;;  %v144_v35 = vld [vmem:[%s1713_s5 + $0x40] sm:$0xff] }
 0x106   :  { %v845_v40 = vpop.f32.mrb[5].mxu0  ;;  %v893_v42 = vpop.f32.mrb[5].mxu1 }
 0x107   :  { %v846_v43 = vadd.f32 %v845_v40, %v844_v37  ;;  %v894_v44 = vadd.f32 %v893_v42, %v892_v38  ;;  %v847_v45 = vpop.f32.mrb[6].mxu0  ;;  %v895_v46 = vpop.f32.mrb[6].mxu1  ;;  %v160_v37 = vld [vmem:[%s1713_s5 + $0xc0] sm:$0xff] }
 0x108   :  { %v848_v48 = vpop.f32.mrb[7].mxu0  ;;  %v896_v50 = vpop.f32.mrb[7].mxu1 }
 0x109   :  { %v571_v51 = vadd.f32 %v846_v43, %v138_v39  ;;  %v587_v52 = vadd.f32 %v894_v44, %v154_v41  ;;  %v849_v53 = vadd.f32 %v848_v48, %v847_v45  ;;  %v897_v54 = vadd.f32 %v896_v50, %v895_v46  ;;  %v145_v43 = vld [vmem:[%s1713_s5 + $0x48] sm:$0xff] }
 0x10a   :  { %v161_v45 = vld [vmem:[%s1713_s5 + $0xc8] sm:$0xff] }
 0x10b   :  { %603 = vst [vmem:[%s1713_s5 + $0x10] sm:$0xff] %v571_v51  ;;  %619 = vst [vmem:[%s1713_s5 + $0x90] sm:$0xff] %v587_v52  ;;  %v572_v55 = vadd.f32 %v849_v53, %v139_v47  ;;  %v588_v56 = vadd.f32 %v897_v54, %v155_v49 }
 0x10d   :  { %604 = vst [vmem:[%s1713_s5 + $0x18] sm:$0xff] %v572_v55  ;;  %620 = vst [vmem:[%s1713_s5 + $0x98] sm:$0xff] %v588_v56  ;;  %v850_v57 = vpop.f32.mrb[8].mxu0  ;;  %v898_v58 = vpop.f32.mrb[8].mxu1  ;;  %v146_v55 = vld [vmem:[%s1713_s5 + $0x50] sm:$0xff] }
 0x10e   :  { %v851_v60 = vpop.f32.mrb[9].mxu0  ;;  %v899_v62 = vpop.f32.mrb[9].mxu1 }
 0x10f   :  { %v852_v63 = vadd.f32 %v851_v60, %v850_v57  ;;  %v900_v0 = vadd.f32 %v899_v62, %v898_v58  ;;  %v853_v1 = vpop.f32.mrb[10].mxu0  ;;  %v901_v2 = vpop.f32.mrb[10].mxu1  ;;  %v162_v57 = vld [vmem:[%s1713_s5 + $0xd0] sm:$0xff] }
 0x110   :  { %v854_v4 = vpop.f32.mrb[11].mxu0  ;;  %v902_v6 = vpop.f32.mrb[11].mxu1 }
 0x111   :  { %v573_v7 = vadd.f32 %v852_v63, %v140_v59  ;;  %v589_v8 = vadd.f32 %v900_v0, %v156_v61  ;;  %v855_v9 = vadd.f32 %v854_v4, %v853_v1  ;;  %v903_v10 = vadd.f32 %v902_v6, %v901_v2  ;;  %v147_v63 = vld [vmem:[%s1713_s5 + $0x58] sm:$0xff] }
 0x112   :  { %v163_v1 = vld [vmem:[%s1713_s5 + $0xd8] sm:$0xff] }
 0x113   :  { %605 = vst [vmem:[%s1713_s5 + $0x20] sm:$0xff] %v573_v7  ;;  %621 = vst [vmem:[%s1713_s5 + $0xa0] sm:$0xff] %v589_v8  ;;  %v574_v11 = vadd.f32 %v855_v9, %v141_v3  ;;  %v590_v12 = vadd.f32 %v903_v10, %v157_v5 }
 0x115   :  { %606 = vst [vmem:[%s1713_s5 + $0x28] sm:$0xff] %v574_v11  ;;  %622 = vst [vmem:[%s1713_s5 + $0xa8] sm:$0xff] %v590_v12  ;;  %v856_v13 = vpop.f32.mrb[12].mxu0  ;;  %v904_v14 = vpop.f32.mrb[12].mxu1  ;;  %v148_v11 = vld [vmem:[%s1713_s5 + $0x60] sm:$0xff] }
 0x116   :  { %v857_v16 = vpop.f32.mrb[13].mxu0  ;;  %v905_v18 = vpop.f32.mrb[13].mxu1 }
 0x117   :  { %v858_v19 = vadd.f32 %v857_v16, %v856_v13  ;;  %v906_v20 = vadd.f32 %v905_v18, %v904_v14  ;;  %v859_v21 = vpop.f32.mrb[14].mxu0  ;;  %v907_v22 = vpop.f32.mrb[14].mxu1  ;;  %v164_v13 = vld [vmem:[%s1713_s5 + $0xe0] sm:$0xff] }
 0x118   :  { %v860_v24 = vpop.f32.mrb[15].mxu0  ;;  %v908_v26 = vpop.f32.mrb[15].mxu1 }
 0x119   :  { %v575_v27 = vadd.f32 %v858_v19, %v142_v15  ;;  %v591_v28 = vadd.f32 %v906_v20, %v158_v17  ;;  %v861_v29 = vadd.f32 %v860_v24, %v859_v21  ;;  %v909_v30 = vadd.f32 %v908_v26, %v907_v22  ;;  %v149_v19 = vld [vmem:[%s1713_s5 + $0x68] sm:$0xff] }
 0x11a   :  { %v165_v21 = vld [vmem:[%s1713_s5 + $0xe8] sm:$0xff] }
 0x11b   :  { %607 = vst [vmem:[%s1713_s5 + $0x30] sm:$0xff] %v575_v27  ;;  %623 = vst [vmem:[%s1713_s5 + $0xb0] sm:$0xff] %v591_v28  ;;  %v576_v31 = vadd.f32 %v861_v29, %v143_v23  ;;  %v592_v32 = vadd.f32 %v909_v30, %v159_v25 }
 0x11d   :  { %608 = vst [vmem:[%s1713_s5 + $0x38] sm:$0xff] %v576_v31  ;;  %624 = vst [vmem:[%s1713_s5 + $0xb8] sm:$0xff] %v592_v32  ;;  %v862_v33 = vpop.f32.mrb[16].mxu0  ;;  %v910_v34 = vpop.f32.mrb[16].mxu1  ;;  %v150_v31 = vld [vmem:[%s1713_s5 + $0x70] sm:$0xff] }
 0x11e   :  { %v863_v36 = vpop.f32.mrb[17].mxu0  ;;  %v911_v38 = vpop.f32.mrb[17].mxu1 }
 0x11f   :  { %v864_v39 = vadd.f32 %v863_v36, %v862_v33  ;;  %v912_v40 = vadd.f32 %v911_v38, %v910_v34  ;;  %v865_v41 = vpop.f32.mrb[18].mxu0  ;;  %v913_v42 = vpop.f32.mrb[18].mxu1  ;;  %v166_v33 = vld [vmem:[%s1713_s5 + $0xf0] sm:$0xff] }
 0x120   :  { %v866_v44 = vpop.f32.mrb[19].mxu0  ;;  %v914_v46 = vpop.f32.mrb[19].mxu1 }
 0x121   :  { %v577_v47 = vadd.f32 %v864_v39, %v144_v35  ;;  %v593_v48 = vadd.f32 %v912_v40, %v160_v37  ;;  %v867_v49 = vadd.f32 %v866_v44, %v865_v41  ;;  %v915_v50 = vadd.f32 %v914_v46, %v913_v42  ;;  %v151_v39 = vld [vmem:[%s1713_s5 + $0x78] sm:$0xff] }
 0x122   :  { %v167_v41 = vld [vmem:[%s1713_s5 + $0xf8] sm:$0xff] }
 0x123   :  { %609 = vst [vmem:[%s1713_s5 + $0x40] sm:$0xff] %v577_v47  ;;  %625 = vst [vmem:[%s1713_s5 + $0xc0] sm:$0xff] %v593_v48  ;;  %v578_v51 = vadd.f32 %v867_v49, %v145_v43  ;;  %v594_v52 = vadd.f32 %v915_v50, %v161_v45 }
 0x125   :  { %610 = vst [vmem:[%s1713_s5 + $0x48] sm:$0xff] %v578_v51  ;;  %626 = vst [vmem:[%s1713_s5 + $0xc8] sm:$0xff] %v594_v52  ;;  %v868_v53 = vpop.f32.mrb[20].mxu0  ;;  %v916_v54 = vpop.f32.mrb[20].mxu1 }
 0x126   :  { %v869_v56 = vpop.f32.mrb[21].mxu0  ;;  %v917_v58 = vpop.f32.mrb[21].mxu1 }
 0x127   :  { %v870_v59 = vadd.f32 %v869_v56, %v868_v53  ;;  %v918_v60 = vadd.f32 %v917_v58, %v916_v54  ;;  %v871_v61 = vpop.f32.mrb[22].mxu0  ;;  %v919_v62 = vpop.f32.mrb[22].mxu1 }
 0x128   :  { %v872_v0 = vpop.f32.mrb[23].mxu0  ;;  %v920_v2 = vpop.f32.mrb[23].mxu1 }
 0x129   :  { %v579_v3 = vadd.f32 %v870_v59, %v146_v55  ;;  %v595_v4 = vadd.f32 %v918_v60, %v162_v57  ;;  %v873_v5 = vadd.f32 %v872_v0, %v871_v61  ;;  %v921_v6 = vadd.f32 %v920_v2, %v919_v62 }
 0x12b   :  { %611 = vst [vmem:[%s1713_s5 + $0x50] sm:$0xff] %v579_v3  ;;  %627 = vst [vmem:[%s1713_s5 + $0xd0] sm:$0xff] %v595_v4  ;;  %v580_v7 = vadd.f32 %v873_v5, %v147_v63  ;;  %v596_v8 = vadd.f32 %v921_v6, %v163_v1 }
 0x12d   :  { %612 = vst [vmem:[%s1713_s5 + $0x58] sm:$0xff] %v580_v7  ;;  %628 = vst [vmem:[%s1713_s5 + $0xd8] sm:$0xff] %v596_v8  ;;  %v874_v9 = vpop.f32.mrb[24].mxu0  ;;  %v922_v10 = vpop.f32.mrb[24].mxu1 }
 0x12e   :  { %v875_v12 = vpop.f32.mrb[25].mxu0  ;;  %v923_v14 = vpop.f32.mrb[25].mxu1 }
 0x12f   :  { %v876_v15 = vadd.f32 %v875_v12, %v874_v9  ;;  %v924_v16 = vadd.f32 %v923_v14, %v922_v10  ;;  %v877_v17 = vpop.f32.mrb[26].mxu0  ;;  %v925_v18 = vpop.f32.mrb[26].mxu1 }
 0x130   :  { %v878_v20 = vpop.f32.mrb[27].mxu0  ;;  %v926_v22 = vpop.f32.mrb[27].mxu1 }
 0x131   :  { %v581_v23 = vadd.f32 %v876_v15, %v148_v11  ;;  %v597_v24 = vadd.f32 %v924_v16, %v164_v13  ;;  %v879_v25 = vadd.f32 %v878_v20, %v877_v17  ;;  %v927_v26 = vadd.f32 %v926_v22, %v925_v18 }
 0x133   :  { %613 = vst [vmem:[%s1713_s5 + $0x60] sm:$0xff] %v581_v23  ;;  %629 = vst [vmem:[%s1713_s5 + $0xe0] sm:$0xff] %v597_v24  ;;  %v582_v27 = vadd.f32 %v879_v25, %v149_v19  ;;  %v598_v28 = vadd.f32 %v927_v26, %v165_v21 }
 0x135   :  { %614 = vst [vmem:[%s1713_s5 + $0x68] sm:$0xff] %v582_v27  ;;  %630 = vst [vmem:[%s1713_s5 + $0xe8] sm:$0xff] %v598_v28  ;;  %v880_v29 = vpop.f32.mrb[28].mxu0  ;;  %v928_v30 = vpop.f32.mrb[28].mxu1 }
 0x136   :  { %v881_v32 = vpop.f32.mrb[29].mxu0  ;;  %v929_v34 = vpop.f32.mrb[29].mxu1 }
 0x137   :  { %v882_v35 = vadd.f32 %v881_v32, %v880_v29  ;;  %v930_v36 = vadd.f32 %v929_v34, %v928_v30  ;;  %v883_v37 = vpop.f32.mrb[30].mxu0  ;;  %v931_v38 = vpop.f32.mrb[30].mxu1 }
 0x138   :  { %v884_v40 = vpop.f32.mrb[31].mxu0  ;;  %v932_v42 = vpop.f32.mrb[31].mxu1 }
 0x139   :  { %v583_v43 = vadd.f32 %v882_v35, %v150_v31  ;;  %v599_v44 = vadd.f32 %v930_v36, %v166_v33  ;;  %v885_v45 = vadd.f32 %v884_v40, %v883_v37  ;;  %v933_v46 = vadd.f32 %v932_v42, %v931_v38 }
 0x13b   :  { %615 = vst [vmem:[%s1713_s5 + $0x70] sm:$0xff] %v583_v43  ;;  %631 = vst [vmem:[%s1713_s5 + $0xf0] sm:$0xff] %v599_v44  ;;  %v584_v47 = vadd.f32 %v885_v45, %v151_v39  ;;  %v600_v48 = vadd.f32 %v933_v46, %v167_v41 }
 0x13d   :  { %616 = vst [vmem:[%s1713_s5 + $0x78] sm:$0xff] %v584_v47  ;;  %632 = vst [vmem:[%s1713_s5 + $0xf8] sm:$0xff] %v600_v48 }
 0x13e PF:  { %v636_v49 = vld [vmem:[%s1712_s4] sm:$0xff]  ;;  %v637_v51 = vld [vmem:[%s1712_s4 + $0x8] sm:$0xff]  ;;  %v638_v54 = vld [vmem:[%s1712_s4 + $0x10] sm:$0xff] }
 0x13f   :  { %v668_v50 = vld [vmem:[%s1713_s5] sm:$0xff]  ;;  %v669_v53 = vld [vmem:[%s1713_s5 + $0x8] sm:$0xff]  ;;  %v670_v55 = vld [vmem:[%s1713_s5 + $0x10] sm:$0xff] }
 0x140   :  { %v700_v52 = vadd.f32 %v668_v50, %v636_v49  ;;  %v701_v56 = vadd.f32 %v669_v53, %v637_v51  ;;  %v702_v57 = vadd.f32 %v670_v55, %v638_v54  ;;  %v639_v58 = vld [vmem:[%s1712_s4 + $0x18] sm:$0xff]  ;;  %v640_v60 = vld [vmem:[%s1712_s4 + $0x20] sm:$0xff]  ;;  %v641_v63 = vld [vmem:[%s1712_s4 + $0x28] sm:$0xff] }
 0x141   :  { %v671_v59 = vld [vmem:[%s1713_s5 + $0x18] sm:$0xff]  ;;  %v672_v62 = vld [vmem:[%s1713_s5 + $0x20] sm:$0xff]  ;;  %v673_v0 = vld [vmem:[%s1713_s5 + $0x28] sm:$0xff] }
 0x142   :  { %732 = vst [vmem:[%s1714_s6] sm:$0xff] %v700_v52  ;;  %v703_v61 = vadd.f32 %v671_v59, %v639_v58  ;;  %733 = vst [vmem:[%s1714_s6 + $0x8] sm:$0xff] %v701_v56  ;;  %v704_v1 = vadd.f32 %v672_v62, %v640_v60  ;;  %v705_v2 = vadd.f32 %v673_v0, %v641_v63  ;;  %v642_v3 = vld [vmem:[%s1712_s4 + $0x30] sm:$0xff]  ;;  %v643_v5 = vld [vmem:[%s1712_s4 + $0x38] sm:$0xff] }
 0x143   :  { %734 = vst [vmem:[%s1714_s6 + $0x10] sm:$0xff] %v702_v57  ;;  %v674_v4 = vld [vmem:[%s1713_s5 + $0x30] sm:$0xff]  ;;  %v675_v7 = vld [vmem:[%s1713_s5 + $0x38] sm:$0xff]  ;;  %v644_v8 = vld [vmem:[%s1712_s4 + $0x40] sm:$0xff] }
 0x144   :  { %735 = vst [vmem:[%s1714_s6 + $0x18] sm:$0xff] %v703_v61  ;;  %v706_v6 = vadd.f32 %v674_v4, %v642_v3  ;;  %v676_v9 = vld [vmem:[%s1713_s5 + $0x40] sm:$0xff]  ;;  %736 = vst [vmem:[%s1714_s6 + $0x20] sm:$0xff] %v704_v1  ;;  %v707_v10 = vadd.f32 %v675_v7, %v643_v5  ;;  %v645_v12 = vld [vmem:[%s1712_s4 + $0x48] sm:$0xff] }
 0x145   :  { %737 = vst [vmem:[%s1714_s6 + $0x28] sm:$0xff] %v705_v2  ;;  %v708_v11 = vadd.f32 %v676_v9, %v644_v8  ;;  %v677_v13 = vld [vmem:[%s1713_s5 + $0x48] sm:$0xff]  ;;  %v646_v14 = vld [vmem:[%s1712_s4 + $0x50] sm:$0xff]  ;;  %v647_v17 = vld [vmem:[%s1712_s4 + $0x58] sm:$0xff] }
 0x146   :  { %738 = vst [vmem:[%s1714_s6 + $0x30] sm:$0xff] %v706_v6  ;;  %v709_v15 = vadd.f32 %v677_v13, %v645_v12  ;;  %v678_v16 = vld [vmem:[%s1713_s5 + $0x50] sm:$0xff]  ;;  %v679_v18 = vld [vmem:[%s1713_s5 + $0x58] sm:$0xff]  ;;  %739 = vst [vmem:[%s1714_s6 + $0x38] sm:$0xff] %v707_v10 }
 0x147   :  { %740 = vst [vmem:[%s1714_s6 + $0x40] sm:$0xff] %v708_v11  ;;  %v710_v19 = vadd.f32 %v678_v16, %v646_v14  ;;  %v711_v20 = vadd.f32 %v679_v18, %v647_v17  ;;  %v648_v21 = vld [vmem:[%s1712_s4 + $0x60] sm:$0xff]  ;;  %v649_v23 = vld [vmem:[%s1712_s4 + $0x68] sm:$0xff]  ;;  %v650_v26 = vld [vmem:[%s1712_s4 + $0x70] sm:$0xff] }
 0x148   :  { %v680_v22 = vld [vmem:[%s1713_s5 + $0x60] sm:$0xff]  ;;  %741 = vst [vmem:[%s1714_s6 + $0x48] sm:$0xff] %v709_v15  ;;  %v681_v25 = vld [vmem:[%s1713_s5 + $0x68] sm:$0xff]  ;;  %v682_v27 = vld [vmem:[%s1713_s5 + $0x70] sm:$0xff] }
 0x149   :  { %v712_v24 = vadd.f32 %v680_v22, %v648_v21  ;;  %742 = vst [vmem:[%s1714_s6 + $0x50] sm:$0xff] %v710_v19  ;;  %743 = vst [vmem:[%s1714_s6 + $0x58] sm:$0xff] %v711_v20  ;;  %v713_v28 = vadd.f32 %v681_v25, %v649_v23  ;;  %v714_v29 = vadd.f32 %v682_v27, %v650_v26  ;;  %v651_v30 = vld [vmem:[%s1712_s4 + $0x78] sm:$0xff]  ;;  %v652_v32 = vld [vmem:[%s1712_s4 + $0x80] sm:$0xff] }
 0x14a   :  { %v683_v31 = vld [vmem:[%s1713_s5 + $0x78] sm:$0xff]  ;;  %v684_v34 = vld [vmem:[%s1713_s5 + $0x80] sm:$0xff]  ;;  %v653_v35 = vld [vmem:[%s1712_s4 + $0x88] sm:$0xff] }
 0x14b   :  { %744 = vst [vmem:[%s1714_s6 + $0x60] sm:$0xff] %v712_v24  ;;  %v715_v33 = vadd.f32 %v683_v31, %v651_v30  ;;  %v685_v36 = vld [vmem:[%s1713_s5 + $0x88] sm:$0xff]  ;;  %745 = vst [vmem:[%s1714_s6 + $0x68] sm:$0xff] %v713_v28  ;;  %v716_v37 = vadd.f32 %v684_v34, %v652_v32  ;;  %v654_v39 = vld [vmem:[%s1712_s4 + $0x90] sm:$0xff] }
 0x14c   :  { %746 = vst [vmem:[%s1714_s6 + $0x70] sm:$0xff] %v714_v29  ;;  %v717_v38 = vadd.f32 %v685_v36, %v653_v35  ;;  %v686_v40 = vld [vmem:[%s1713_s5 + $0x90] sm:$0xff]  ;;  %v655_v41 = vld [vmem:[%s1712_s4 + $0x98] sm:$0xff]  ;;  %v656_v44 = vld [vmem:[%s1712_s4 + $0xa0] sm:$0xff] }
 0x14d   :  { %747 = vst [vmem:[%s1714_s6 + $0x78] sm:$0xff] %v715_v33  ;;  %v718_v42 = vadd.f32 %v686_v40, %v654_v39  ;;  %v687_v43 = vld [vmem:[%s1713_s5 + $0x98] sm:$0xff]  ;;  %v688_v45 = vld [vmem:[%s1713_s5 + $0xa0] sm:$0xff]  ;;  %748 = vst [vmem:[%s1714_s6 + $0x80] sm:$0xff] %v716_v37 }
 0x14e   :  { %749 = vst [vmem:[%s1714_s6 + $0x88] sm:$0xff] %v717_v38  ;;  %v719_v46 = vadd.f32 %v687_v43, %v655_v41  ;;  %v720_v47 = vadd.f32 %v688_v45, %v656_v44  ;;  %v657_v48 = vld [vmem:[%s1712_s4 + $0xa8] sm:$0xff]  ;;  %v658_v50 = vld [vmem:[%s1712_s4 + $0xb0] sm:$0xff]  ;;  %v659_v53 = vld [vmem:[%s1712_s4 + $0xb8] sm:$0xff] }
 0x14f   :  { %v689_v49 = vld [vmem:[%s1713_s5 + $0xa8] sm:$0xff]  ;;  %750 = vst [vmem:[%s1714_s6 + $0x90] sm:$0xff] %v718_v42  ;;  %v690_v52 = vld [vmem:[%s1713_s5 + $0xb0] sm:$0xff]  ;;  %v691_v54 = vld [vmem:[%s1713_s5 + $0xb8] sm:$0xff] }
 0x150   :  { %v721_v51 = vadd.f32 %v689_v49, %v657_v48  ;;  %751 = vst [vmem:[%s1714_s6 + $0x98] sm:$0xff] %v719_v46  ;;  %752 = vst [vmem:[%s1714_s6 + $0xa0] sm:$0xff] %v720_v47  ;;  %v722_v55 = vadd.f32 %v690_v52, %v658_v50  ;;  %v723_v56 = vadd.f32 %v691_v54, %v659_v53  ;;  %v660_v57 = vld [vmem:[%s1712_s4 + $0xc0] sm:$0xff]  ;;  %v661_v59 = vld [vmem:[%s1712_s4 + $0xc8] sm:$0xff] }
 0x151   :  { %v692_v58 = vld [vmem:[%s1713_s5 + $0xc0] sm:$0xff]  ;;  %v693_v61 = vld [vmem:[%s1713_s5 + $0xc8] sm:$0xff]  ;;  %v662_v62 = vld [vmem:[%s1712_s4 + $0xd0] sm:$0xff] }
 0x152   :  { %753 = vst [vmem:[%s1714_s6 + $0xa8] sm:$0xff] %v721_v51  ;;  %v724_v60 = vadd.f32 %v692_v58, %v660_v57  ;;  %v694_v63 = vld [vmem:[%s1713_s5 + $0xd0] sm:$0xff]  ;;  %754 = vst [vmem:[%s1714_s6 + $0xb0] sm:$0xff] %v722_v55  ;;  %v725_v0 = vadd.f32 %v693_v61, %v661_v59  ;;  %v663_v2 = vld [vmem:[%s1712_s4 + $0xd8] sm:$0xff] }
 0x153   :  { %755 = vst [vmem:[%s1714_s6 + $0xb8] sm:$0xff] %v723_v56  ;;  %v726_v1 = vadd.f32 %v694_v63, %v662_v62  ;;  %v695_v3 = vld [vmem:[%s1713_s5 + $0xd8] sm:$0xff]  ;;  %v664_v4 = vld [vmem:[%s1712_s4 + $0xe0] sm:$0xff]  ;;  %v665_v7 = vld [vmem:[%s1712_s4 + $0xe8] sm:$0xff] }
 0x154   :  { %756 = vst [vmem:[%s1714_s6 + $0xc0] sm:$0xff] %v724_v60  ;;  %v727_v5 = vadd.f32 %v695_v3, %v663_v2  ;;  %v696_v6 = vld [vmem:[%s1713_s5 + $0xe0] sm:$0xff]  ;;  %v697_v8 = vld [vmem:[%s1713_s5 + $0xe8] sm:$0xff]  ;;  %757 = vst [vmem:[%s1714_s6 + $0xc8] sm:$0xff] %v725_v0 }
 0x155   :  { %758 = vst [vmem:[%s1714_s6 + $0xd0] sm:$0xff] %v726_v1  ;;  %v728_v9 = vadd.f32 %v696_v6, %v664_v4  ;;  %v729_v10 = vadd.f32 %v697_v8, %v665_v7  ;;  %v666_v11 = vld [vmem:[%s1712_s4 + $0xf0] sm:$0xff]  ;;  %v667_v13 = vld [vmem:[%s1712_s4 + $0xf8] sm:$0xff] }
 0x156   :  { %v698_v12 = vld [vmem:[%s1713_s5 + $0xf0] sm:$0xff]  ;;  %759 = vst [vmem:[%s1714_s6 + $0xd8] sm:$0xff] %v727_v5  ;;  %v699_v15 = vld [vmem:[%s1713_s5 + $0xf8] sm:$0xff] }
 0x157   :  { %v730_v14 = vadd.f32 %v698_v12, %v666_v11  ;;  %760 = vst [vmem:[%s1714_s6 + $0xe0] sm:$0xff] %v728_v9  ;;  %761 = vst [vmem:[%s1714_s6 + $0xe8] sm:$0xff] %v729_v10  ;;  %v731_v16 = vadd.f32 %v699_v15, %v667_v13 }
 0x159   :  { %762 = vst [vmem:[%s1714_s6 + $0xf0] sm:$0xff] %v730_v14  ;;  %763 = vst [vmem:[%s1714_s6 + $0xf8] sm:$0xff] %v731_v16 }

// kernel: _lambda_.6
= control target key start
LH: loop header
LB: loop body
LE: loop exit
PB: predicated region body
PF: predicated region fallthrough
CT: control target
= control target key end

     0   :  { %14 = vsyncpa [#allocation6], 0  ;;  %v1039_v0 = vmov 0.0   ;;  %s1400_s0 = inlined_call_operand.<no memory space> [shape: s32[1], index: 0, kind: input, shape index: {}]   ;;  %s1401_s1 = inlined_call_operand.<no memory space> [shape: s32[1,1], index: 1, kind: input, shape index: {}]   ;;  %s1402_s2 = inlined_call_operand.vmem [shape: bf16[256,256], index: 2, kind: input, shape index: {}]   ;;  %s1403_s3 = inlined_call_operand.vmem [shape: f32[256,128], index: 3, kind: input, shape index: {}]   ;;  %s1404_s4 = inlined_call_operand.vmem [shape: f32[256,128], index: 4, kind: input, shape index: {}]   ;;  %s1405_s5 = inlined_call_operand.hbm [shape: f32[256,128], index: 5, kind: output, shape index: {0}]   ;;  %s1406_s6 = inlined_call_operand.vmem [shape: f32[256,128], index: 6, kind: output, shape index: {1}]  }
   0x1   :  { %s797_s23 = sshll.u32 %s1401_s1, 1  ;;  %s799_s26 = sshll.u32 %s1401_s1, 5  ;;  %100 = vst [vmem:[#allocation5] sm:$0xff] %v1039_v0  ;;  %101 = vst [vmem:[#allocation5 + $0x8] sm:$0xff] %v1039_v0 }
   0x2   :  { %p1088_p0 = scmp.lt.s32.totalorder %s797_s23, 1  ;;  %p1096_p1 = scmp.lt.s32.totalorder %s799_s26, 31  ;;  %102 = vst [vmem:[#allocation5 + $0x10] sm:$0xff] %v1039_v0  ;;  %103 = vst [vmem:[#allocation5 + $0x18] sm:$0xff] %v1039_v0 }
   0x3   :  { %104 = vst [vmem:[#allocation5 + $0x20] sm:$0xff] %v1039_v0  ;;  %105 = vst [vmem:[#allocation5 + $0x28] sm:$0xff] %v1039_v0  ;;  %p802_p2 = scmp.le.s32.totalorder %s1400_s0, 0 }
   0x4   :  { %106 = vst [vmem:[#allocation5 + $0x30] sm:$0xff] %v1039_v0  ;;  %107 = vst [vmem:[#allocation5 + $0x38] sm:$0xff] %v1039_v0  ;;  %s1410_s23 = smov (!%p1088_p0, %s797_s23), 1  ;;  %s1412_s26 = smov (!%p1096_p1, %s799_s26), 31 }
   0x5   :  { %108 = vst [vmem:[#allocation5 + $0x40] sm:$0xff] %v1039_v0  ;;  %109 = vst [vmem:[#allocation5 + $0x48] sm:$0xff] %v1039_v0  ;;  %s798_s13 = sshll.u32 %s1410_s23, 2  ;;  %s800_s17 = sshll.u32 %s1412_s26, 3 }
   0x6   :  { %110 = vst [vmem:[#allocation5 + $0x50] sm:$0xff] %v1039_v0  ;;  %111 = vst [vmem:[#allocation5 + $0x58] sm:$0xff] %v1039_v0  ;;  %s1115_s16 = scalar_lea.vmem %s1402_s2, %s798_s13  ;;  %s1120_s20 = scalar_lea.vmem %s1403_s3, %s800_s17 }
   0x7   :  { %112 = vst [vmem:[#allocation5 + $0x60] sm:$0xff] %v1039_v0  ;;  %113 = vst [vmem:[#allocation5 + $0x68] sm:$0xff] %v1039_v0  ;;  %v217_v1 = vld [vmem:[%s1120_s20 + $0x80] sm:$0xff] (!%p802_p2)  ;;  %v218_v2 = vld [vmem:[%s1120_s20 + $0x88] sm:$0xff] (!%p802_p2) }
   0x8   :  { %114 = vst [vmem:[#allocation5 + $0x70] sm:$0xff] %v1039_v0  ;;  %115 = vst [vmem:[#allocation5 + $0x78] sm:$0xff] %v1039_v0  ;;  %v201_v3 = vld [vmem:[%s1120_s20] sm:$0xff] (!%p802_p2)  ;;  %v241_v4 = vpack.c.bf16 (!%p802_p2), %v218_v2, %v217_v1  ;;  %v202_v5 = vld [vmem:[%s1120_s20 + $0x8] sm:$0xff] (!%p802_p2) }
   0x9   :  { %116 = vst [vmem:[#allocation5 + $0x80] sm:$0xff] %v1039_v0  ;;  %117 = vst [vmem:[#allocation5 + $0x88] sm:$0xff] %v1039_v0  ;;  %v219_v6 = vld [vmem:[%s1120_s20 + $0x90] sm:$0xff] (!%p802_p2)  ;;  %v220_v7 = vld [vmem:[%s1120_s20 + $0x98] sm:$0xff] (!%p802_p2)  ;;  %v233_v8 = vpack.c.bf16 (!%p802_p2), %v202_v5, %v201_v3 }
   0xa   :  { %118 = vst [vmem:[#allocation5 + $0x90] sm:$0xff] %v1039_v0  ;;  %119 = vst [vmem:[#allocation5 + $0x98] sm:$0xff] %v1039_v0  ;;  %136 = sbr.rel (%p802_p2) target bundleno = 318 (0x13e), region = 21  ;;  %v242_v9 = vpack.c.bf16 (!%p802_p2), %v220_v7, %v219_v6  ;;  %v203_v10 = vld [vmem:[%s1120_s20 + $0x10] sm:$0xff] (!%p802_p2)  ;;  %v204_v11 = vld [vmem:[%s1120_s20 + $0x18] sm:$0xff] (!%p802_p2)  ;;  %835 = vmatprep.subr.bf16.mxu0 (!%p802_p2), %v241_v4  ;;  %947 = vmatprep.subr.bf16.mxu1 (!%p802_p2), %v241_v4 }
   0xb   :  { %120 = vst [vmem:[#allocation5 + $0xa0] sm:$0xff] %v1039_v0  ;;  %121 = vst [vmem:[#allocation5 + $0xa8] sm:$0xff] %v1039_v0  ;;  %v221_v12 = vld [vmem:[%s1120_s20 + $0xa0] sm:$0xff] (!%p802_p2)  ;;  %v222_v13 = vld [vmem:[%s1120_s20 + $0xa8] sm:$0xff] (!%p802_p2)  ;;  %836 = vmatpush3.bf16.msra.mxu0 (!%p802_p2), %v233_v8  ;;  %955 = vmatpush3.bf16.msra.mxu1 (!%p802_p2), %v233_v8  ;;  %v234_v14 = vpack.c.bf16 (!%p802_p2), %v204_v11, %v203_v10 }
   0xc   :  { %122 = vst [vmem:[#allocation5 + $0xb0] sm:$0xff] %v1039_v0  ;;  %123 = vst [vmem:[#allocation5 + $0xb8] sm:$0xff] %v1039_v0  ;;  %837 = vmatprep.subr.bf16.mxu0 (!%p802_p2), %v242_v9  ;;  %948 = vmatprep.subr.bf16.mxu1 (!%p802_p2), %v242_v9  ;;  %v243_v15 = vpack.c.bf16 (!%p802_p2), %v222_v13, %v221_v12  ;;  %v205_v16 = vld [vmem:[%s1120_s20 + $0x20] sm:$0xff] (!%p802_p2)  ;;  %v206_v17 = vld [vmem:[%s1120_s20 + $0x28] sm:$0xff] (!%p802_p2) }
   0xd   :  { %124 = vst [vmem:[#allocation5 + $0xc0] sm:$0xff] %v1039_v0  ;;  %125 = vst [vmem:[#allocation5 + $0xc8] sm:$0xff] %v1039_v0  ;;  %v223_v18 = vld [vmem:[%s1120_s20 + $0xb0] sm:$0xff] (!%p802_p2)  ;;  %v224_v19 = vld [vmem:[%s1120_s20 + $0xb8] sm:$0xff] (!%p802_p2)  ;;  %v235_v20 = vpack.c.bf16 (!%p802_p2), %v206_v17, %v205_v16 }
   0xe   :  { %126 = vst [vmem:[#allocation5 + $0xd0] sm:$0xff] %v1039_v0  ;;  %127 = vst [vmem:[#allocation5 + $0xd8] sm:$0xff] %v1039_v0  ;;  %v244_v21 = vpack.c.bf16 (!%p802_p2), %v224_v19, %v223_v18  ;;  %v207_v22 = vld [vmem:[%s1120_s20 + $0x30] sm:$0xff] (!%p802_p2)  ;;  %v208_v23 = vld [vmem:[%s1120_s20 + $0x38] sm:$0xff] (!%p802_p2) }
   0xf   :  { %128 = vst [vmem:[#allocation5 + $0xe0] sm:$0xff] %v1039_v0  ;;  %129 = vst [vmem:[#allocation5 + $0xe8] sm:$0xff] %v1039_v0  ;;  %838 = vmatpush3.bf16.msra.mxu0 (!%p802_p2), %v234_v14  ;;  %956 = vmatpush3.bf16.msra.mxu1 (!%p802_p2), %v234_v14  ;;  %v225_v24 = vld [vmem:[%s1120_s20 + $0xc0] sm:$0xff] (!%p802_p2)  ;;  %v226_v25 = vld [vmem:[%s1120_s20 + $0xc8] sm:$0xff] (!%p802_p2)  ;;  %v236_v29 = vpack.c.bf16 (!%p802_p2), %v208_v23, %v207_v22 }
  0x10   :  { %130 = vst [vmem:[#allocation5 + $0xf0] sm:$0xff] %v1039_v0  ;;  %131 = vst [vmem:[#allocation5 + $0xf8] sm:$0xff] %v1039_v0  ;;  %839 = vmatprep.subr.bf16.mxu0 (!%p802_p2), %v243_v15  ;;  %949 = vmatprep.subr.bf16.mxu1 (!%p802_p2), %v243_v15  ;;  %v209_v26 = vld [vmem:[%s1120_s20 + $0x40] sm:$0xff] (!%p802_p2)  ;;  %v210_v27 = vld [vmem:[%s1120_s20 + $0x48] sm:$0xff] (!%p802_p2)  ;;  %v245_v31 = vpack.c.bf16 (!%p802_p2), %v226_v25, %v225_v24 }
  0x11   :  { %v969_v28 = vld [vmem:[%s1115_s16 + $0x4] ss:$8 sps:$4 sm:$0xff]   ;;  %v227_v30 = vld [vmem:[%s1120_s20 + $0xd0] sm:$0xff]  ;;  %v228_v33 = vld [vmem:[%s1120_s20 + $0xd8] sm:$0xff]  ;;  %v237_v34 = vpack.c.bf16 %v210_v27, %v209_v26 }
  0x12   :  { %v972_v32 = vld [vmem:[%s1115_s16 + $0x84] ss:$8 sps:$4 sm:$0xff]   ;;  %441 = vmatprep.mubr.bf16.mxu0 %v969_v28  ;;  %v211_v35 = vld [vmem:[%s1120_s20 + $0x50] sm:$0xff]  ;;  %v246_v36 = vpack.c.bf16 %v228_v33, %v227_v30  ;;  %v212_v37 = vld [vmem:[%s1120_s20 + $0x58] sm:$0xff] }
  0x13   :  { %840 = vmatpush3.bf16.msra.mxu0 %v235_v20  ;;  %957 = vmatpush3.bf16.msra.mxu1 %v235_v20  ;;  %v229_v38 = vld [vmem:[%s1120_s20 + $0xe0] sm:$0xff]  ;;  %v230_v39 = vld [vmem:[%s1120_s20 + $0xe8] sm:$0xff]  ;;  %v238_v40 = vpack.c.bf16 %v212_v37, %v211_v35  ;;  %v231_v44 = vld [vmem:[%s1120_s20 + $0xf0] sm:$0xff] }
  0x14   :  { %841 = vmatprep.subr.bf16.mxu0 %v244_v21  ;;  %950 = vmatprep.subr.bf16.mxu1 %v244_v21  ;;  %v213_v41 = vld [vmem:[%s1120_s20 + $0x60] sm:$0xff]  ;;  %v214_v42 = vld [vmem:[%s1120_s20 + $0x68] sm:$0xff]  ;;  %v247_v43 = vpack.c.bf16 %v230_v39, %v229_v38  ;;  %v232_v45 = vld [vmem:[%s1120_s20 + $0xf8] sm:$0xff] }
  0x15   :  { %505 = vmatprep.mubr.bf16.mxu1 %v972_v32  ;;  %v239_v46 = vpack.c.bf16 %v214_v42, %v213_v41  ;;  %v215_v47 = vld [vmem:[%s1120_s20 + $0x70] sm:$0xff]  ;;  %v248_v48 = vpack.c.bf16 %v232_v45, %v231_v44  ;;  %v216_v49 = vld [vmem:[%s1120_s20 + $0x78] sm:$0xff]  ;;  %v967_v51 = vld [vmem:[%s1115_s16] ss:$8 sps:$4 sm:$0xff]  }
  0x16   :  { %v240_v50 = vpack.c.bf16 %v216_v49, %v215_v47  ;;  %v970_v52 = vld [vmem:[%s1115_s16 + $0x80] ss:$8 sps:$4 sm:$0xff]   ;;  %v973_v53 = vld [vmem:[%s1115_s16 + $0x14] ss:$8 sps:$4 sm:$0xff]   ;;  %v977_v55 = vld [vmem:[%s1115_s16 + $0x10] ss:$8 sps:$4 sm:$0xff]  }
  0x17   :  { %842 = vmatpush3.bf16.msra.mxu0 %v236_v29  ;;  %958 = vmatpush3.bf16.msra.mxu1 %v236_v29  ;;  %v975_v54 = vld [vmem:[%s1115_s16 + $0x94] ss:$8 sps:$4 sm:$0xff]   ;;  %v978_v56 = vld [vmem:[%s1115_s16 + $0x90] ss:$8 sps:$4 sm:$0xff]   ;;  %v979_v57 = vld [vmem:[%s1115_s16 + $0x24] ss:$8 sps:$4 sm:$0xff]  }
  0x18   :  { %843 = vmatprep.subr.bf16.mxu0 %v245_v31  ;;  %951 = vmatprep.subr.bf16.mxu1 %v245_v31  ;;  %v981_v58 = vld [vmem:[%s1115_s16 + $0xa4] ss:$8 sps:$4 sm:$0xff]   ;;  %v983_v59 = vld [vmem:[%s1115_s16 + $0x20] ss:$8 sps:$4 sm:$0xff]   ;;  %v985_v61 = vld [vmem:[%s1115_s16 + $0x34] ss:$8 sps:$4 sm:$0xff]  }
  0x19   :  { %v984_v60 = vld [vmem:[%s1115_s16 + $0xa0] ss:$8 sps:$4 sm:$0xff]   ;;  %v987_v62 = vld [vmem:[%s1115_s16 + $0xb4] ss:$8 sps:$4 sm:$0xff]   ;;  %v989_v63 = vld [vmem:[%s1115_s16 + $0x30] ss:$8 sps:$4 sm:$0xff]  }
  0x1a   :  { %v990_v0 = vld [vmem:[%s1115_s16 + $0xb0] ss:$8 sps:$4 sm:$0xff]   ;;  %v991_v1 = vld [vmem:[%s1115_s16 + $0x44] ss:$8 sps:$4 sm:$0xff]   ;;  %v995_v3 = vld [vmem:[%s1115_s16 + $0x40] ss:$8 sps:$4 sm:$0xff]  }
  0x1b   :  { %844 = vmatpush3.bf16.msra.mxu0 %v237_v34  ;;  %959 = vmatpush3.bf16.msra.mxu1 %v237_v34  ;;  %v993_v2 = vld [vmem:[%s1115_s16 + $0xc4] ss:$8 sps:$4 sm:$0xff]   ;;  %v996_v4 = vld [vmem:[%s1115_s16 + $0xc0] ss:$8 sps:$4 sm:$0xff]   ;;  %v997_v5 = vld [vmem:[%s1115_s16 + $0x54] ss:$8 sps:$4 sm:$0xff]  }
  0x1c   :  { %845 = vmatprep.subr.bf16.mxu0 %v246_v36  ;;  %952 = vmatprep.subr.bf16.mxu1 %v246_v36  ;;  %v999_v6 = vld [vmem:[%s1115_s16 + $0xd4] ss:$8 sps:$4 sm:$0xff]   ;;  %v1001_v7 = vld [vmem:[%s1115_s16 + $0x50] ss:$8 sps:$4 sm:$0xff]   ;;  %v1003_v9 = vld [vmem:[%s1115_s16 + $0x64] ss:$8 sps:$4 sm:$0xff]  }
  0x1d   :  { %v1002_v8 = vld [vmem:[%s1115_s16 + $0xd0] ss:$8 sps:$4 sm:$0xff]   ;;  %v1005_v10 = vld [vmem:[%s1115_s16 + $0xe4] ss:$8 sps:$4 sm:$0xff]   ;;  %v1007_v11 = vld [vmem:[%s1115_s16 + $0x60] ss:$8 sps:$4 sm:$0xff]  }
  0x1e   :  { %v1008_v12 = vld [vmem:[%s1115_s16 + $0xe0] ss:$8 sps:$4 sm:$0xff]   ;;  %v1009_v13 = vld [vmem:[%s1115_s16 + $0x74] ss:$8 sps:$4 sm:$0xff]   ;;  %v1013_v15 = vld [vmem:[%s1115_s16 + $0x70] ss:$8 sps:$4 sm:$0xff]  }
  0x1f   :  { %846 = vmatpush3.bf16.msra.mxu0 %v238_v40  ;;  %960 = vmatpush3.bf16.msra.mxu1 %v238_v40  ;;  %v1011_v14 = vld [vmem:[%s1115_s16 + $0xf4] ss:$8 sps:$4 sm:$0xff]   ;;  %v1014_v16 = vld [vmem:[%s1115_s16 + $0xf0] ss:$8 sps:$4 sm:$0xff]   ;;  %v137_v19 = vld [vmem:[#allocation5] sm:$0xff] }
  0x20   :  { %847 = vmatprep.subr.bf16.mxu0 %v247_v43  ;;  %953 = vmatprep.subr.bf16.mxu1 %v247_v43  ;;  %v153_v21 = vld [vmem:[#allocation5 + $0x80] sm:$0xff]  ;;  %v138_v27 = vld [vmem:[#allocation5 + $0x8] sm:$0xff]  ;;  %v139_v39 = vld [vmem:[#allocation5 + $0x10] sm:$0xff] }
  0x21   :  { %v154_v29 = vld [vmem:[#allocation5 + $0x88] sm:$0xff]  ;;  %v155_v41 = vld [vmem:[#allocation5 + $0x90] sm:$0xff]  ;;  %v140_v47 = vld [vmem:[#allocation5 + $0x18] sm:$0xff] }
  0x22   :  { %v156_v49 = vld [vmem:[#allocation5 + $0x98] sm:$0xff] }
  0x23   :  { %848 = vmatpush3.bf16.msra.mxu0 %v239_v46  ;;  %961 = vmatpush3.bf16.msra.mxu1 %v239_v46 }
  0x24   :  { %849 = vmatprep.subr.bf16.mxu0 %v248_v48  ;;  %954 = vmatprep.subr.bf16.mxu1 %v248_v48 }
  0x27   :  { %850 = vmatpush3.bf16.msra.mxu0 %v240_v50  ;;  %962 = vmatpush3.bf16.msra.mxu1 %v240_v50 }
  0x2a   :  { %442 = vmatmul.mubr.bf16.vlgmr.msra.gmra.mrb[0].mxu0 %v967_v51  ;;  %506 = vmatmul.mubr.bf16.vlgmr.msra.gmra.mrb[0].mxu1 %v970_v52 }
  0x2b   :  { %449 = vmatprep.mubr.bf16.mxu0 %v973_v53  ;;  %513 = vmatprep.mubr.bf16.mxu1 %v975_v54 }
  0x32   :  { %450 = vmatmul.mubr.bf16.gmra.mrb[4].mxu0 %v977_v55  ;;  %514 = vmatmul.mubr.bf16.gmra.mrb[4].mxu1 %v978_v56 }
  0x33   :  { %457 = vmatprep.mubr.bf16.mxu0 %v979_v57  ;;  %521 = vmatprep.mubr.bf16.mxu1 %v981_v58 }
  0x3a   :  { %458 = vmatmul.mubr.bf16.gmra.mrb[8].mxu0 %v983_v59  ;;  %522 = vmatmul.mubr.bf16.gmra.mrb[8].mxu1 %v984_v60  ;;  %v141_v59 = vld [vmem:[#allocation5 + $0x20] sm:$0xff] }
  0x3b   :  { %465 = vmatprep.mubr.bf16.mxu0 %v985_v61  ;;  %529 = vmatprep.mubr.bf16.mxu1 %v987_v62  ;;  %v157_v61 = vld [vmem:[#allocation5 + $0xa0] sm:$0xff] }
  0x42   :  { %466 = vmatmul.mubr.bf16.gmra.mrb[12].mxu0 %v989_v63  ;;  %530 = vmatmul.mubr.bf16.gmra.mrb[12].mxu1 %v990_v0 }
  0x43   :  { %473 = vmatprep.mubr.bf16.mxu0 %v991_v1  ;;  %537 = vmatprep.mubr.bf16.mxu1 %v993_v2 }
  0x4a   :  { %474 = vmatmul.mubr.bf16.gmra.mrb[16].mxu0 %v995_v3  ;;  %538 = vmatmul.mubr.bf16.gmra.mrb[16].mxu1 %v996_v4  ;;  %v142_v3 = vld [vmem:[#allocation5 + $0x28] sm:$0xff] }
  0x4b   :  { %481 = vmatprep.mubr.bf16.mxu0 %v997_v5  ;;  %545 = vmatprep.mubr.bf16.mxu1 %v999_v6  ;;  %v158_v5 = vld [vmem:[#allocation5 + $0xa8] sm:$0xff] }
  0x52   :  { %482 = vmatmul.mubr.bf16.gmra.mrb[20].mxu0 %v1001_v7  ;;  %546 = vmatmul.mubr.bf16.gmra.mrb[20].mxu1 %v1002_v8 }
  0x53   :  { %489 = vmatprep.mubr.bf16.mxu0 %v1003_v9  ;;  %553 = vmatprep.mubr.bf16.mxu1 %v1005_v10 }
  0x5a   :  { %490 = vmatmul.mubr.bf16.gmra.mrb[24].mxu0 %v1007_v11  ;;  %554 = vmatmul.mubr.bf16.gmra.mrb[24].mxu1 %v1008_v12 }
  0x5b   :  { %497 = vmatprep.mubr.bf16.mxu0 %v1009_v13  ;;  %561 = vmatprep.mubr.bf16.mxu1 %v1011_v14 }
  0x62   :  { %498 = vmatmul.mubr.bf16.gmra.mrb[28].mxu0 %v1013_v15  ;;  %562 = vmatmul.mubr.bf16.gmra.mrb[28].mxu1 %v1014_v16  ;;  %v143_v15 = vld [vmem:[#allocation5 + $0x30] sm:$0xff] }
  0xfd   :  { %v851_v17 = vpop.f32.mrb[0].mxu0  ;;  %v899_v18 = vpop.f32.mrb[0].mxu1 }
  0xfe   :  { %v852_v20 = vpop.f32.mrb[1].mxu0  ;;  %v900_v22 = vpop.f32.mrb[1].mxu1 }
  0xff   :  { %v853_v23 = vadd.f32 %v852_v20, %v851_v17  ;;  %v901_v24 = vadd.f32 %v900_v22, %v899_v18  ;;  %v854_v25 = vpop.f32.mrb[2].mxu0  ;;  %v902_v26 = vpop.f32.mrb[2].mxu1  ;;  %v159_v17 = vld [vmem:[#allocation5 + $0xb0] sm:$0xff] }
 0x100   :  { %v855_v28 = vpop.f32.mrb[3].mxu0  ;;  %v903_v30 = vpop.f32.mrb[3].mxu1 }
 0x101   :  { %v570_v31 = vadd.f32 %v853_v23, %v137_v19  ;;  %v586_v32 = vadd.f32 %v901_v24, %v153_v21  ;;  %v856_v33 = vadd.f32 %v855_v28, %v854_v25  ;;  %v904_v34 = vadd.f32 %v903_v30, %v902_v26  ;;  %v144_v23 = vld [vmem:[#allocation5 + $0x38] sm:$0xff] }
 0x102   :  { %v160_v25 = vld [vmem:[#allocation5 + $0xb8] sm:$0xff] }
 0x103   :  { %602 = vst [vmem:[#allocation5] sm:$0xff] %v570_v31  ;;  %618 = vst [vmem:[#allocation5 + $0x80] sm:$0xff] %v586_v32  ;;  %v571_v35 = vadd.f32 %v856_v33, %v138_v27  ;;  %v587_v36 = vadd.f32 %v904_v34, %v154_v29 }
 0x105   :  { %603 = vst [vmem:[#allocation5 + $0x8] sm:$0xff] %v571_v35  ;;  %619 = vst [vmem:[#allocation5 + $0x88] sm:$0xff] %v587_v36  ;;  %v857_v37 = vpop.f32.mrb[4].mxu0  ;;  %v905_v38 = vpop.f32.mrb[4].mxu1  ;;  %v145_v35 = vld [vmem:[#allocation5 + $0x40] sm:$0xff] }
 0x106   :  { %v858_v40 = vpop.f32.mrb[5].mxu0  ;;  %v906_v42 = vpop.f32.mrb[5].mxu1 }
 0x107   :  { %v859_v43 = vadd.f32 %v858_v40, %v857_v37  ;;  %v907_v44 = vadd.f32 %v906_v42, %v905_v38  ;;  %v860_v45 = vpop.f32.mrb[6].mxu0  ;;  %v908_v46 = vpop.f32.mrb[6].mxu1  ;;  %v161_v37 = vld [vmem:[#allocation5 + $0xc0] sm:$0xff] }
 0x108   :  { %v861_v48 = vpop.f32.mrb[7].mxu0  ;;  %v909_v50 = vpop.f32.mrb[7].mxu1 }
 0x109   :  { %v572_v51 = vadd.f32 %v859_v43, %v139_v39  ;;  %v588_v52 = vadd.f32 %v907_v44, %v155_v41  ;;  %v862_v53 = vadd.f32 %v861_v48, %v860_v45  ;;  %v910_v54 = vadd.f32 %v909_v50, %v908_v46  ;;  %v146_v43 = vld [vmem:[#allocation5 + $0x48] sm:$0xff] }
 0x10a   :  { %v162_v45 = vld [vmem:[#allocation5 + $0xc8] sm:$0xff] }
 0x10b   :  { %604 = vst [vmem:[#allocation5 + $0x10] sm:$0xff] %v572_v51  ;;  %620 = vst [vmem:[#allocation5 + $0x90] sm:$0xff] %v588_v52  ;;  %v573_v55 = vadd.f32 %v862_v53, %v140_v47  ;;  %v589_v56 = vadd.f32 %v910_v54, %v156_v49 }
 0x10d   :  { %605 = vst [vmem:[#allocation5 + $0x18] sm:$0xff] %v573_v55  ;;  %621 = vst [vmem:[#allocation5 + $0x98] sm:$0xff] %v589_v56  ;;  %v863_v57 = vpop.f32.mrb[8].mxu0  ;;  %v911_v58 = vpop.f32.mrb[8].mxu1  ;;  %v147_v55 = vld [vmem:[#allocation5 + $0x50] sm:$0xff] }
 0x10e   :  { %v864_v60 = vpop.f32.mrb[9].mxu0  ;;  %v912_v62 = vpop.f32.mrb[9].mxu1 }
 0x10f   :  { %v865_v63 = vadd.f32 %v864_v60, %v863_v57  ;;  %v913_v0 = vadd.f32 %v912_v62, %v911_v58  ;;  %v866_v1 = vpop.f32.mrb[10].mxu0  ;;  %v914_v2 = vpop.f32.mrb[10].mxu1  ;;  %v163_v57 = vld [vmem:[#allocation5 + $0xd0] sm:$0xff] }
 0x110   :  { %v867_v4 = vpop.f32.mrb[11].mxu0  ;;  %v915_v6 = vpop.f32.mrb[11].mxu1 }
 0x111   :  { %v574_v7 = vadd.f32 %v865_v63, %v141_v59  ;;  %v590_v8 = vadd.f32 %v913_v0, %v157_v61  ;;  %v868_v9 = vadd.f32 %v867_v4, %v866_v1  ;;  %v916_v10 = vadd.f32 %v915_v6, %v914_v2  ;;  %v148_v63 = vld [vmem:[#allocation5 + $0x58] sm:$0xff] }
 0x112   :  { %v164_v1 = vld [vmem:[#allocation5 + $0xd8] sm:$0xff] }
 0x113   :  { %606 = vst [vmem:[#allocation5 + $0x20] sm:$0xff] %v574_v7  ;;  %622 = vst [vmem:[#allocation5 + $0xa0] sm:$0xff] %v590_v8  ;;  %v575_v11 = vadd.f32 %v868_v9, %v142_v3  ;;  %v591_v12 = vadd.f32 %v916_v10, %v158_v5 }
 0x115   :  { %607 = vst [vmem:[#allocation5 + $0x28] sm:$0xff] %v575_v11  ;;  %623 = vst [vmem:[#allocation5 + $0xa8] sm:$0xff] %v591_v12  ;;  %v869_v13 = vpop.f32.mrb[12].mxu0  ;;  %v917_v14 = vpop.f32.mrb[12].mxu1  ;;  %v149_v11 = vld [vmem:[#allocation5 + $0x60] sm:$0xff] }
 0x116   :  { %v870_v16 = vpop.f32.mrb[13].mxu0  ;;  %v918_v18 = vpop.f32.mrb[13].mxu1 }
 0x117   :  { %v871_v19 = vadd.f32 %v870_v16, %v869_v13  ;;  %v919_v20 = vadd.f32 %v918_v18, %v917_v14  ;;  %v872_v21 = vpop.f32.mrb[14].mxu0  ;;  %v920_v22 = vpop.f32.mrb[14].mxu1  ;;  %v165_v13 = vld [vmem:[#allocation5 + $0xe0] sm:$0xff] }
 0x118   :  { %v873_v24 = vpop.f32.mrb[15].mxu0  ;;  %v921_v26 = vpop.f32.mrb[15].mxu1 }
 0x119   :  { %v576_v27 = vadd.f32 %v871_v19, %v143_v15  ;;  %v592_v28 = vadd.f32 %v919_v20, %v159_v17  ;;  %v874_v29 = vadd.f32 %v873_v24, %v872_v21  ;;  %v922_v30 = vadd.f32 %v921_v26, %v920_v22  ;;  %v150_v19 = vld [vmem:[#allocation5 + $0x68] sm:$0xff] }
 0x11a   :  { %v166_v21 = vld [vmem:[#allocation5 + $0xe8] sm:$0xff] }
 0x11b   :  { %608 = vst [vmem:[#allocation5 + $0x30] sm:$0xff] %v576_v27  ;;  %624 = vst [vmem:[#allocation5 + $0xb0] sm:$0xff] %v592_v28  ;;  %v577_v31 = vadd.f32 %v874_v29, %v144_v23  ;;  %v593_v32 = vadd.f32 %v922_v30, %v160_v25 }
 0x11d   :  { %609 = vst [vmem:[#allocation5 + $0x38] sm:$0xff] %v577_v31  ;;  %625 = vst [vmem:[#allocation5 + $0xb8] sm:$0xff] %v593_v32  ;;  %v875_v33 = vpop.f32.mrb[16].mxu0  ;;  %v923_v34 = vpop.f32.mrb[16].mxu1  ;;  %v151_v31 = vld [vmem:[#allocation5 + $0x70] sm:$0xff] }
 0x11e   :  { %v876_v36 = vpop.f32.mrb[17].mxu0  ;;  %v924_v38 = vpop.f32.mrb[17].mxu1 }
 0x11f   :  { %v877_v39 = vadd.f32 %v876_v36, %v875_v33  ;;  %v925_v40 = vadd.f32 %v924_v38, %v923_v34  ;;  %v878_v41 = vpop.f32.mrb[18].mxu0  ;;  %v926_v42 = vpop.f32.mrb[18].mxu1  ;;  %v167_v33 = vld [vmem:[#allocation5 + $0xf0] sm:$0xff] }
 0x120   :  { %v879_v44 = vpop.f32.mrb[19].mxu0  ;;  %v927_v46 = vpop.f32.mrb[19].mxu1 }
 0x121   :  { %v578_v47 = vadd.f32 %v877_v39, %v145_v35  ;;  %v594_v48 = vadd.f32 %v925_v40, %v161_v37  ;;  %v880_v49 = vadd.f32 %v879_v44, %v878_v41  ;;  %v928_v50 = vadd.f32 %v927_v46, %v926_v42  ;;  %v152_v39 = vld [vmem:[#allocation5 + $0x78] sm:$0xff] }
 0x122   :  { %v168_v41 = vld [vmem:[#allocation5 + $0xf8] sm:$0xff] }
 0x123   :  { %610 = vst [vmem:[#allocation5 + $0x40] sm:$0xff] %v578_v47  ;;  %626 = vst [vmem:[#allocation5 + $0xc0] sm:$0xff] %v594_v48  ;;  %v579_v51 = vadd.f32 %v880_v49, %v146_v43  ;;  %v595_v52 = vadd.f32 %v928_v50, %v162_v45 }
 0x125   :  { %611 = vst [vmem:[#allocation5 + $0x48] sm:$0xff] %v579_v51  ;;  %627 = vst [vmem:[#allocation5 + $0xc8] sm:$0xff] %v595_v52  ;;  %v881_v53 = vpop.f32.mrb[20].mxu0  ;;  %v929_v54 = vpop.f32.mrb[20].mxu1 }
 0x126   :  { %v882_v56 = vpop.f32.mrb[21].mxu0  ;;  %v930_v58 = vpop.f32.mrb[21].mxu1 }
 0x127   :  { %v883_v59 = vadd.f32 %v882_v56, %v881_v53  ;;  %v931_v60 = vadd.f32 %v930_v58, %v929_v54  ;;  %v884_v61 = vpop.f32.mrb[22].mxu0  ;;  %v932_v62 = vpop.f32.mrb[22].mxu1 }
 0x128   :  { %v885_v0 = vpop.f32.mrb[23].mxu0  ;;  %v933_v2 = vpop.f32.mrb[23].mxu1 }
 0x129   :  { %v580_v3 = vadd.f32 %v883_v59, %v147_v55  ;;  %v596_v4 = vadd.f32 %v931_v60, %v163_v57  ;;  %v886_v5 = vadd.f32 %v885_v0, %v884_v61  ;;  %v934_v6 = vadd.f32 %v933_v2, %v932_v62 }
 0x12b   :  { %612 = vst [vmem:[#allocation5 + $0x50] sm:$0xff] %v580_v3  ;;  %628 = vst [vmem:[#allocation5 + $0xd0] sm:$0xff] %v596_v4  ;;  %v581_v7 = vadd.f32 %v886_v5, %v148_v63  ;;  %v597_v8 = vadd.f32 %v934_v6, %v164_v1 }
 0x12d   :  { %613 = vst [vmem:[#allocation5 + $0x58] sm:$0xff] %v581_v7  ;;  %629 = vst [vmem:[#allocation5 + $0xd8] sm:$0xff] %v597_v8  ;;  %v887_v9 = vpop.f32.mrb[24].mxu0  ;;  %v935_v10 = vpop.f32.mrb[24].mxu1 }
 0x12e   :  { %v888_v12 = vpop.f32.mrb[25].mxu0  ;;  %v936_v14 = vpop.f32.mrb[25].mxu1 }
 0x12f   :  { %v889_v15 = vadd.f32 %v888_v12, %v887_v9  ;;  %v937_v16 = vadd.f32 %v936_v14, %v935_v10  ;;  %v890_v17 = vpop.f32.mrb[26].mxu0  ;;  %v938_v18 = vpop.f32.mrb[26].mxu1 }
 0x130   :  { %v891_v20 = vpop.f32.mrb[27].mxu0  ;;  %v939_v22 = vpop.f32.mrb[27].mxu1 }
 0x131   :  { %v582_v23 = vadd.f32 %v889_v15, %v149_v11  ;;  %v598_v24 = vadd.f32 %v937_v16, %v165_v13  ;;  %v892_v25 = vadd.f32 %v891_v20, %v890_v17  ;;  %v940_v26 = vadd.f32 %v939_v22, %v938_v18 }
 0x133   :  { %614 = vst [vmem:[#allocation5 + $0x60] sm:$0xff] %v582_v23  ;;  %630 = vst [vmem:[#allocation5 + $0xe0] sm:$0xff] %v598_v24  ;;  %v583_v27 = vadd.f32 %v892_v25, %v150_v19  ;;  %v599_v28 = vadd.f32 %v940_v26, %v166_v21 }
 0x135   :  { %615 = vst [vmem:[#allocation5 + $0x68] sm:$0xff] %v583_v27  ;;  %631 = vst [vmem:[#allocation5 + $0xe8] sm:$0xff] %v599_v28  ;;  %v893_v29 = vpop.f32.mrb[28].mxu0  ;;  %v941_v30 = vpop.f32.mrb[28].mxu1 }
 0x136   :  { %v894_v32 = vpop.f32.mrb[29].mxu0  ;;  %v942_v34 = vpop.f32.mrb[29].mxu1 }
 0x137   :  { %v895_v35 = vadd.f32 %v894_v32, %v893_v29  ;;  %v943_v36 = vadd.f32 %v942_v34, %v941_v30  ;;  %v896_v37 = vpop.f32.mrb[30].mxu0  ;;  %v944_v38 = vpop.f32.mrb[30].mxu1 }
 0x138   :  { %v897_v40 = vpop.f32.mrb[31].mxu0  ;;  %v945_v42 = vpop.f32.mrb[31].mxu1 }
 0x139   :  { %v584_v43 = vadd.f32 %v895_v35, %v151_v31  ;;  %v600_v44 = vadd.f32 %v943_v36, %v167_v33  ;;  %v898_v45 = vadd.f32 %v897_v40, %v896_v37  ;;  %v946_v46 = vadd.f32 %v945_v42, %v944_v38 }
 0x13b   :  { %616 = vst [vmem:[#allocation5 + $0x70] sm:$0xff] %v584_v43  ;;  %632 = vst [vmem:[#allocation5 + $0xf0] sm:$0xff] %v600_v44  ;;  %v585_v47 = vadd.f32 %v898_v45, %v152_v39  ;;  %v601_v48 = vadd.f32 %v946_v46, %v168_v41 }
 0x13d   :  { %617 = vst [vmem:[#allocation5 + $0x78] sm:$0xff] %v585_v47  ;;  %633 = vst [vmem:[#allocation5 + $0xf8] sm:$0xff] %v601_v48 }
 0x13e PF:  { %v637_v49 = vld [vmem:[%s1404_s4] sm:$0xff]  ;;  %v638_v51 = vld [vmem:[%s1404_s4 + $0x8] sm:$0xff]  ;;  %v639_v54 = vld [vmem:[%s1404_s4 + $0x10] sm:$0xff]  ;;  %s1040_s2 = smov [#allocation5]  }
 0x13f   :  { %v669_v50 = vld [vmem:[#allocation5] sm:$0xff]  ;;  %v670_v53 = vld [vmem:[#allocation5 + $0x8] sm:$0xff]  ;;  %v671_v55 = vld [vmem:[#allocation5 + $0x10] sm:$0xff]  ;;  %s770_s3 = sshll.u32 %s1040_s2, 4  ;;  %s1348_s3 = int_to_ptr.vmem [resolvable:$true] %s770_s3 }
 0x140   :  { %v701_v52 = vadd.f32 %v669_v50, %v637_v49  ;;  %v702_v56 = vadd.f32 %v670_v53, %v638_v51  ;;  %v703_v57 = vadd.f32 %v671_v55, %v639_v54  ;;  %v640_v58 = vld [vmem:[%s1404_s4 + $0x18] sm:$0xff]  ;;  %v641_v60 = vld [vmem:[%s1404_s4 + $0x20] sm:$0xff]  ;;  %v642_v63 = vld [vmem:[%s1404_s4 + $0x28] sm:$0xff]  ;;  %s1015_s30 = scalar_lea.vmem %s1348_s3, 4096  ;;  %p1020_p4 = scmp.lt.s32.totalorder %s1348_s3, %s1348_s3 }
 0x141   :  { %v672_v59 = vld [vmem:[#allocation5 + $0x18] sm:$0xff]  ;;  %v673_v62 = vld [vmem:[#allocation5 + $0x20] sm:$0xff]  ;;  %v674_v0 = vld [vmem:[#allocation5 + $0x28] sm:$0xff]  ;;  %p1016_p3 = scmp.ne.s32.totalorder %s1348_s3, %s1015_s30  ;;  %p1021_p5 = scmp.lt.s32.totalorder %s1015_s30, %s1015_s30 }
 0x142   :  { %733 = vst [vmem:[%s1406_s6] sm:$0xff] %v701_v52  ;;  %v704_v61 = vadd.f32 %v672_v59, %v640_v58  ;;  %734 = vst [vmem:[%s1406_s6 + $0x8] sm:$0xff] %v702_v56  ;;  %v705_v1 = vadd.f32 %v673_v62, %v641_v60  ;;  %v706_v2 = vadd.f32 %v674_v0, %v642_v63  ;;  %v643_v3 = vld [vmem:[%s1404_s4 + $0x30] sm:$0xff]  ;;  %v644_v5 = vld [vmem:[%s1404_s4 + $0x38] sm:$0xff] }
 0x143   :  { %735 = vst [vmem:[%s1406_s6 + $0x10] sm:$0xff] %v703_v57  ;;  %v675_v4 = vld [vmem:[#allocation5 + $0x30] sm:$0xff]  ;;  %v676_v7 = vld [vmem:[#allocation5 + $0x38] sm:$0xff]  ;;  %v645_v8 = vld [vmem:[%s1404_s4 + $0x40] sm:$0xff]  ;;  %p1022_p6 = por %p1021_p5, %p1020_p4 }
 0x144   :  { %736 = vst [vmem:[%s1406_s6 + $0x18] sm:$0xff] %v704_v61  ;;  %v707_v6 = vadd.f32 %v675_v4, %v643_v3  ;;  %v677_v9 = vld [vmem:[#allocation5 + $0x40] sm:$0xff]  ;;  %737 = vst [vmem:[%s1406_s6 + $0x20] sm:$0xff] %v705_v1  ;;  %v708_v10 = vadd.f32 %v676_v7, %v644_v5  ;;  %v646_v12 = vld [vmem:[%s1404_s4 + $0x48] sm:$0xff] }
 0x145   :  { %738 = vst [vmem:[%s1406_s6 + $0x28] sm:$0xff] %v706_v2  ;;  %v709_v11 = vadd.f32 %v677_v9, %v645_v8  ;;  %v678_v13 = vld [vmem:[#allocation5 + $0x48] sm:$0xff]  ;;  %v647_v14 = vld [vmem:[%s1404_s4 + $0x50] sm:$0xff]  ;;  %v648_v17 = vld [vmem:[%s1404_s4 + $0x58] sm:$0xff]  ;;  %p1023_p7 = pnand %p1022_p6, %p1016_p3 }
 0x146   :  { %739 = vst [vmem:[%s1406_s6 + $0x30] sm:$0xff] %v707_v6  ;;  %v710_v15 = vadd.f32 %v678_v13, %v646_v12  ;;  %v679_v16 = vld [vmem:[#allocation5 + $0x50] sm:$0xff]  ;;  %v680_v18 = vld [vmem:[#allocation5 + $0x58] sm:$0xff]  ;;  %740 = vst [vmem:[%s1406_s6 + $0x38] sm:$0xff] %v708_v10 }
 0x147   :  { %741 = vst [vmem:[%s1406_s6 + $0x40] sm:$0xff] %v709_v11  ;;  %v711_v19 = vadd.f32 %v679_v16, %v647_v14  ;;  %v712_v20 = vadd.f32 %v680_v18, %v648_v17  ;;  %v649_v21 = vld [vmem:[%s1404_s4 + $0x60] sm:$0xff]  ;;  %v650_v23 = vld [vmem:[%s1404_s4 + $0x68] sm:$0xff]  ;;  %v651_v26 = vld [vmem:[%s1404_s4 + $0x70] sm:$0xff] }
 0x148   :  { %v681_v22 = vld [vmem:[#allocation5 + $0x60] sm:$0xff]  ;;  %742 = vst [vmem:[%s1406_s6 + $0x48] sm:$0xff] %v710_v15  ;;  %v682_v25 = vld [vmem:[#allocation5 + $0x68] sm:$0xff]  ;;  %v683_v27 = vld [vmem:[#allocation5 + $0x70] sm:$0xff] }
 0x149   :  { %v713_v24 = vadd.f32 %v681_v22, %v649_v21  ;;  %743 = vst [vmem:[%s1406_s6 + $0x50] sm:$0xff] %v711_v19  ;;  %744 = vst [vmem:[%s1406_s6 + $0x58] sm:$0xff] %v712_v20  ;;  %v714_v28 = vadd.f32 %v682_v25, %v650_v23  ;;  %v715_v29 = vadd.f32 %v683_v27, %v651_v26  ;;  %v652_v30 = vld [vmem:[%s1404_s4 + $0x78] sm:$0xff]  ;;  %v653_v32 = vld [vmem:[%s1404_s4 + $0x80] sm:$0xff] }
 0x14a   :  { %v684_v31 = vld [vmem:[#allocation5 + $0x78] sm:$0xff]  ;;  %v685_v34 = vld [vmem:[#allocation5 + $0x80] sm:$0xff]  ;;  %v654_v35 = vld [vmem:[%s1404_s4 + $0x88] sm:$0xff] }
 0x14b   :  { %745 = vst [vmem:[%s1406_s6 + $0x60] sm:$0xff] %v713_v24  ;;  %v716_v33 = vadd.f32 %v684_v31, %v652_v30  ;;  %v686_v36 = vld [vmem:[#allocation5 + $0x88] sm:$0xff]  ;;  %746 = vst [vmem:[%s1406_s6 + $0x68] sm:$0xff] %v714_v28  ;;  %v717_v37 = vadd.f32 %v685_v34, %v653_v32  ;;  %v655_v39 = vld [vmem:[%s1404_s4 + $0x90] sm:$0xff] }
 0x14c   :  { %747 = vst [vmem:[%s1406_s6 + $0x70] sm:$0xff] %v715_v29  ;;  %v718_v38 = vadd.f32 %v686_v36, %v654_v35  ;;  %v687_v40 = vld [vmem:[#allocation5 + $0x90] sm:$0xff]  ;;  %v656_v41 = vld [vmem:[%s1404_s4 + $0x98] sm:$0xff]  ;;  %v657_v44 = vld [vmem:[%s1404_s4 + $0xa0] sm:$0xff] }
 0x14d   :  { %748 = vst [vmem:[%s1406_s6 + $0x78] sm:$0xff] %v716_v33  ;;  %v719_v42 = vadd.f32 %v687_v40, %v655_v39  ;;  %v688_v43 = vld [vmem:[#allocation5 + $0x98] sm:$0xff]  ;;  %v689_v45 = vld [vmem:[#allocation5 + $0xa0] sm:$0xff]  ;;  %749 = vst [vmem:[%s1406_s6 + $0x80] sm:$0xff] %v717_v37 }
 0x14e   :  { %750 = vst [vmem:[%s1406_s6 + $0x88] sm:$0xff] %v718_v38  ;;  %v720_v46 = vadd.f32 %v688_v43, %v656_v41  ;;  %v721_v47 = vadd.f32 %v689_v45, %v657_v44  ;;  %v658_v48 = vld [vmem:[%s1404_s4 + $0xa8] sm:$0xff]  ;;  %v659_v50 = vld [vmem:[%s1404_s4 + $0xb0] sm:$0xff]  ;;  %v660_v53 = vld [vmem:[%s1404_s4 + $0xb8] sm:$0xff] }
 0x14f   :  { %v690_v49 = vld [vmem:[#allocation5 + $0xa8] sm:$0xff]  ;;  %751 = vst [vmem:[%s1406_s6 + $0x90] sm:$0xff] %v719_v42  ;;  %v691_v52 = vld [vmem:[#allocation5 + $0xb0] sm:$0xff]  ;;  %v692_v54 = vld [vmem:[#allocation5 + $0xb8] sm:$0xff] }
 0x150   :  { %v722_v51 = vadd.f32 %v690_v49, %v658_v48  ;;  %752 = vst [vmem:[%s1406_s6 + $0x98] sm:$0xff] %v720_v46  ;;  %753 = vst [vmem:[%s1406_s6 + $0xa0] sm:$0xff] %v721_v47  ;;  %v723_v55 = vadd.f32 %v691_v52, %v659_v50  ;;  %v724_v56 = vadd.f32 %v692_v54, %v660_v53  ;;  %v661_v57 = vld [vmem:[%s1404_s4 + $0xc0] sm:$0xff]  ;;  %v662_v59 = vld [vmem:[%s1404_s4 + $0xc8] sm:$0xff] }
 0x151   :  { %v693_v58 = vld [vmem:[#allocation5 + $0xc0] sm:$0xff]  ;;  %v694_v61 = vld [vmem:[#allocation5 + $0xc8] sm:$0xff]  ;;  %v663_v62 = vld [vmem:[%s1404_s4 + $0xd0] sm:$0xff] }
 0x152   :  { %754 = vst [vmem:[%s1406_s6 + $0xa8] sm:$0xff] %v722_v51  ;;  %v725_v60 = vadd.f32 %v693_v58, %v661_v57  ;;  %v695_v63 = vld [vmem:[#allocation5 + $0xd0] sm:$0xff]  ;;  %755 = vst [vmem:[%s1406_s6 + $0xb0] sm:$0xff] %v723_v55  ;;  %v726_v0 = vadd.f32 %v694_v61, %v662_v59  ;;  %v664_v2 = vld [vmem:[%s1404_s4 + $0xd8] sm:$0xff] }
 0x153   :  { %756 = vst [vmem:[%s1406_s6 + $0xb8] sm:$0xff] %v724_v56  ;;  %v727_v1 = vadd.f32 %v695_v63, %v663_v62  ;;  %v696_v3 = vld [vmem:[#allocation5 + $0xd8] sm:$0xff]  ;;  %v665_v4 = vld [vmem:[%s1404_s4 + $0xe0] sm:$0xff]  ;;  %v666_v7 = vld [vmem:[%s1404_s4 + $0xe8] sm:$0xff] }
 0x154   :  { %757 = vst [vmem:[%s1406_s6 + $0xc0] sm:$0xff] %v725_v60  ;;  %v728_v5 = vadd.f32 %v696_v3, %v664_v2  ;;  %v697_v6 = vld [vmem:[#allocation5 + $0xe0] sm:$0xff]  ;;  %v698_v8 = vld [vmem:[#allocation5 + $0xe8] sm:$0xff]  ;;  %758 = vst [vmem:[%s1406_s6 + $0xc8] sm:$0xff] %v726_v0 }
 0x155   :  { %759 = vst [vmem:[%s1406_s6 + $0xd0] sm:$0xff] %v727_v1  ;;  %v729_v9 = vadd.f32 %v697_v6, %v665_v4  ;;  %v730_v10 = vadd.f32 %v698_v8, %v666_v7  ;;  %v667_v11 = vld [vmem:[%s1404_s4 + $0xf0] sm:$0xff]  ;;  %v668_v13 = vld [vmem:[%s1404_s4 + $0xf8] sm:$0xff] }
 0x156   :  { %v699_v12 = vld [vmem:[#allocation5 + $0xf0] sm:$0xff]  ;;  %760 = vst [vmem:[%s1406_s6 + $0xd8] sm:$0xff] %v728_v5  ;;  %v700_v15 = vld [vmem:[#allocation5 + $0xf8] sm:$0xff] }
 0x157   :  { %v731_v14 = vadd.f32 %v699_v12, %v667_v11 }
 0x158   :  { %1026 = shalt.err (!%p1023_p7)
}
 0x159   :  { %s1027_s9 = scalar_lea.hbm %s1405_s5, 4096 }
 0x15a   :  { %p1028_p8 = scmp.ne.s32.totalorder %s1405_s5, %s1027_s9  ;;  %p1031_p9 = scmp.lt.u32.totalorder %s1027_s9, %s1405_s5 }
 0x15c   :  { %p1033_p10 = pnand %p1031_p9, %p1028_p8 }
 0x15e   :  { %1036 = shalt.err (!%p1033_p10)
}
 0x15f   :  { %s1041_s13 = smov 128   ;;  %s1042_s14 = smov 8   ;;  %761 = vst [vmem:[%s1406_s6 + $0xe0] sm:$0xff] %v729_v9  ;;  %762 = vst [vmem:[%s1406_s6 + $0xe8] sm:$0xff] %v730_v10  ;;  %v732_v16 = vadd.f32 %v700_v15, %v668_v13 }
 0x160   :  { %776 = dma.vmem_to_hbm [thread:$0]  %s1348_s3, 4096, %s1405_s5, [#allocation6], %s1041_s13, %s1041_s13, %s1042_s14  }
 0x161   :  { %763 = vst [vmem:[%s1406_s6 + $0xf0] sm:$0xff] %v731_v14  ;;  %764 = vst [vmem:[%s1406_s6 + $0xf8] sm:$0xff] %v732_v16 }
 0x162   :  { %1037 = dma.done.wait [#allocation6], 4096  }
 0x163   :  { %1038 = vsyncadd [#allocation6], 4294963200 }
 0x164   :  { %784 = vsyncpa [#allocation6], 1 }

</bundles_post_ra>
